<compile_context>
chip_gen: v7x
topology: tpu7x:2x2x1
jax: 0.10.0
libtpu: 0.0.40
codegen_flags: <defaults>
</compile_context>

<pallas_src>
import math
import functools

import numpy as np
import jax
import jax.numpy as jnp
from jax import lax
from jax.experimental import pallas as pl
from jax.experimental.pallas import tpu as pltpu


OUT_PAD = 128  # lane-dense padded width of the final Q layer


# ---------------------------------------------------------------------------
# in-kernel helpers
# ---------------------------------------------------------------------------
def _mm(a, b):
    """bf16 matmul with f32 accumulation."""
    return jnp.dot(a.astype(jnp.bfloat16), b.astype(jnp.bfloat16),
                   preferred_element_type=jnp.float32)


def _attention(qh, kh, vh, mask):
    """One attention head. qh:[M,hd], kh/vh:[Nb,hd] (scale pre-folded into q).
    mask[i, j] True iff edge j -> i."""
    scores = lax.dot_general(
        qh.astype(jnp.bfloat16), kh.astype(jnp.bfloat16),
        (((1,), (1,)), ((), ())),
        preferred_element_type=jnp.float32)                      # [M, Nb]
    masked = jnp.where(mask, scores, jnp.float32(-1e30))
    m = jnp.max(masked, axis=-1, keepdims=True)                  # [M, 1]
    e = jnp.exp(masked - m)                                      # non-edges -> 0
    s = jnp.sum(e, axis=-1, keepdims=True)
    # exact reciprocal (EUP is otherwise idle); zero-in-degree rows -> exact 0
    inv = jnp.where(m > jnp.float32(-1e29),
                    pl.reciprocal(s, approx=False), jnp.float32(0.0))
    return _mm(e, vh) * inv                                      # [M, hd]


# ---------------------------------------------------------------------------
# Pallas kernel (one block of `gb` graphs per grid step)
# ---------------------------------------------------------------------------
def dgnr_kernel(heads, head_dim, gb,
                agent_ref,                                   # scalar-prefetch (SMEM)
                x_ref, adj_ref,
                we1_ref, we2_ref, benc_ref,
                wqkv1_ref, bqkv1_ref,
                wq2_ref, wkv2_ref, bqkv2_ref,
                wqm1a_ref, wqm1bc_ref, bqm1_ref,
                wqm2_ref, bqm2_ref,
                out_ref):
    blk = pl.program_id(0)
    nb = x_ref.shape[0]                      # gb * nodes_per_graph
    KH = heads * head_dim

    adj = adj_ref[...]                       # bf16 [Nb, Nb], block-diag within block
    adj_mask = adj > 0                       # no f32 astype needed

    # ---- encoder MLP (Linear -> ReLU -> Linear) + outer ReLU, batched over block ----
    h = jnp.maximum(_mm(x_ref[...], we1_ref[...]) + benc_ref[0:1, :], 0.0)
    h = jnp.maximum(_mm(h, we2_ref[...]) + benc_ref[1:2, :], 0.0)     # [Nb, hidden]
    h_bf = h.astype(jnp.bfloat16)

    # ---- one-hot agent-row selector (one row per graph of the block) ----
    row_i = lax.broadcasted_iota(jnp.int32, (gb, nb), 0)
    col_i = lax.broadcasted_iota(jnp.int32, (gb, nb), 1)
    onehot = jnp.zeros((gb, nb), jnp.float32)
    for a in range(gb):
        idx = agent_ref[blk * gb + a]                                 # SMEM scalar
        onehot = jnp.where((row_i == a) & (col_i == idx), jnp.float32(1.0), onehot)
    onehot_bf = onehot.astype(jnp.bfloat16)

    x1 = _mm(onehot_bf, h_bf)                                         # [gb, hidden]
    adj_agent_mask = _mm(onehot_bf, adj) > 0                          # [gb, Nb]

    # ---- conv1: single fused QKV projection, per-head attention ----
    qkv1 = _mm(h_bf, wqkv1_ref[...]) + bqkv1_ref[...]                 # [Nb, 3*KH]
    c1_heads = []
    for hh in range(heads):
        lo = hh * head_dim
        qh = qkv1[:, lo:lo + head_dim]
        kh = qkv1[:, KH + lo:KH + lo + head_dim]
        vh = qkv1[:, 2 * KH + lo:2 * KH + lo + head_dim]
        c1_heads.append(_attention(qh, kh, vh, adj_mask))
    c1 = jnp.maximum(jnp.concatenate(c1_heads, axis=-1), 0.0)         # [Nb, KH]
    c1_bf = c1.astype(jnp.bfloat16)

    x2 = _mm(onehot_bf, c1_bf)                                        # [gb, KH]

    # ---- conv2: its output only feeds x3 (agent rows), so compute q at the
    # agent rows only; K/V over the full block with one fused matmul ----
    qa = _mm(x2, wq2_ref[...]) + bqkv2_ref[:, 0:KH]                   # [gb, KH]
    kv = _mm(c1_bf, wkv2_ref[...]) + bqkv2_ref[:, KH:]                # [Nb, 2*KH]
    c2_heads = []
    for hh in range(heads):
        lo = hh * head_dim
        qh = qa[:, lo:lo + head_dim]
        kh = kv[:, lo:lo + head_dim]
        vh = kv[:, KH + lo:KH + lo + head_dim]
        c2_heads.append(_attention(qh, kh, vh, adj_agent_mask))
    x3 = jnp.maximum(jnp.concatenate(c2_heads, axis=-1), 0.0)         # [gb, KH]

    # ---- Q MLP; cat([x1, x2, x3]) folded into split first-layer weights ----
    x23 = jnp.concatenate([x2, x3], axis=-1)                          # [gb, 2*KH]
    qmid = jnp.maximum(_mm(x1, wqm1a_ref[...]) + _mm(x23, wqm1bc_ref[...])
                       + bqm1_ref[...], 0.0)                          # [gb, q_hidden]
    out = _mm(qmid, wqm2_ref[...]) + bqm2_ref[...]                    # [gb, OUT_PAD]
    out_ref[...] = out.astype(out_ref.dtype)


def dgnr_forward(x_blocks, adj_blocks, agent_block, kparams, *, heads, head_dim):
    nblocks, Nb, in_dim = x_blocks.shape
    gb = agent_block.shape[1]
    agent_flat = agent_block.reshape(-1).astype(jnp.int32)
    kernel = functools.partial(dgnr_kernel, heads, head_dim, gb)

    def const_spec(p):
        nd = p.ndim
        return pl.BlockSpec(p.shape, lambda blk, aref, _nd=nd: (0,) * _nd)

    grid_spec = pltpu.PrefetchScalarGridSpec(
        num_scalar_prefetch=1,
        grid=(nblocks,),
        in_specs=[pl.BlockSpec((None, Nb, in_dim), lambda blk, aref: (blk, 0, 0)),
                  pl.BlockSpec((None, Nb, Nb), lambda blk, aref: (blk, 0, 0))]
                 + [const_spec(p) for p in kparams],
        out_specs=pl.BlockSpec((None, gb, OUT_PAD), lambda blk, aref: (blk, 0, 0)),
    )
    out = pl.pallas_call(
        kernel,
        out_shape=jax.ShapeDtypeStruct((nblocks, gb, OUT_PAD), jnp.float32),
        grid_spec=grid_spec,
        compiler_params=pltpu.CompilerParams(
            dimension_semantics=("parallel",)),
    )(agent_flat, x_blocks, adj_blocks, *kparams)
    return out[:, :, :2].reshape(nblocks * gb, 2)


# ---------------------------------------------------------------------------
# parameter construction & kernel-layout prep
# ---------------------------------------------------------------------------
def _init_linear(key, fan_in, fan_out):
    kw, kb = jax.random.split(key)
    w = jax.random.normal(kw, (fan_in, fan_out), jnp.float32) / math.sqrt(fan_in)
    b = jax.random.normal(kb, (1, fan_out), jnp.float32) * 0.01
    return w, b


def make_params(key, input_dim, hidden_dim, heads, q_hidden):
    KH = hidden_dim * heads
    keys = jax.random.split(key, 12)
    we1, be1 = _init_linear(keys[0], input_dim, hidden_dim)
    we2, be2 = _init_linear(keys[1], hidden_dim, hidden_dim)
    wq1, bq1 = _init_linear(keys[2], hidden_dim, KH)
    wk1, bk1 = _init_linear(keys[3], hidden_dim, KH)
    wv1, bv1 = _init_linear(keys[4], hidden_dim, KH)
    wq2, bq2 = _init_linear(keys[5], KH, KH)
    wk2, bk2 = _init_linear(keys[6], KH, KH)
    wv2, bv2 = _init_linear(keys[7], KH, KH)
    wqa, _ = _init_linear(keys[8], hidden_dim, q_hidden)
    wqb, _ = _init_linear(keys[9], KH, q_hidden)
    wqc, bqm1 = _init_linear(keys[10], KH, q_hidden)
    wqm2, bqm2 = _init_linear(keys[11], q_hidden, 2)
    return (we1, be1, we2, be2,
            wq1, bq1, wk1, bk1, wv1, bv1,
            wq2, bq2, wk2, bk2, wv2, bv2,
            wqa, wqb, wqc, bqm1, wqm2, bqm2)


def prep_kernel_params(params, heads, head_dim):
    """Pack the 22 torch-layout tensors into 13 lane-dense kernel slabs."""
    (we1, be1, we2, be2, wq1, bq1, wk1, bk1, wv1, bv1,
     wq2, bq2, wk2, bk2, wv2, bv2, wqa, wqb, wqc, bqm1, wqm2, bqm2) = params
    bf = lambda w: w.astype(jnp.bfloat16)
    scale = 1.0 / math.sqrt(head_dim)

    # encoder biases stacked
    b_enc = jnp.concatenate([be1, be2], axis=0)                       # [2, hidden]

    # conv1: fused QKV, attention scale folded into the q part
    w_qkv1 = bf(jnp.concatenate([wq1 * scale, wk1, wv1], axis=1))     # [hidden, 3*KH]
    b_qkv1 = jnp.concatenate([bq1 * scale, bk1, bv1], axis=1)         # [1, 3*KH]

    # conv2: q weight separate (applied only to agent rows), K/V fused
    w_q2 = bf(wq2 * scale)                                            # [KH, KH]
    w_kv2 = bf(jnp.concatenate([wk2, wv2], axis=1))                   # [KH, 2*KH]
    b_qkv2 = jnp.concatenate([bq2 * scale, bk2, bv2], axis=1)         # [1, 3*KH]

    # Q MLP layer 1: split weights for the folded cat([x1, x2, x3])
    w_qm1a = bf(wqa)                                                  # [hidden, q_hidden]
    w_qm1bc = bf(jnp.concatenate([wqb, wqc], axis=0))                 # [2*KH, q_hidden]

    # final layer padded to a lane-dense 128-wide output (sliced to [:, :2] outside)
    w_qm2p = jnp.zeros((wqm2.shape[0], OUT_PAD), jnp.float32).at[:, :wqm2.shape[1]].set(wqm2)
    b_qm2p = jnp.zeros((1, OUT_PAD), jnp.float32).at[:, :bqm2.shape[1]].set(bqm2)

    return (bf(we1), bf(we2), b_enc,
            w_qkv1, b_qkv1,
            w_q2, w_kv2, b_qkv2,
            w_qm1a, w_qm1bc, bqm1,
            bf(w_qm2p), b_qm2p)


# ---------------------------------------------------------------------------
# host-side preprocessing: block several graphs per grid step
# ---------------------------------------------------------------------------
def block_graphs(x, adj_per_graph, agent_local, num_graphs, n, graphs_per_block):
    assert num_graphs % graphs_per_block == 0
    gb = graphs_per_block
    nblocks = num_graphs // gb
    Nb = gb * n
    in_dim = x.shape[1]

    x_blocks = jnp.asarray(x).reshape(nblocks, Nb, in_dim)

    adj_np = np.asarray(adj_per_graph)
    adj_blocks = np.zeros((nblocks, Nb, Nb), np.float32)
    for b in range(nblocks):
        for gg in range(gb):
            g = b * gb + gg
            adj_blocks[b, gg * n:(gg + 1) * n, gg * n:(gg + 1) * n] = adj_np[g]

    agent_block = (np.asarray(agent_local).reshape(nblocks, gb)
                   + (np.arange(gb) * n)[None, :]).astype(np.int32)
    return x_blocks, jnp.asarray(adj_blocks), jnp.asarray(agent_block)


# ---------------------------------------------------------------------------
# graph construction (host-side preprocessing of the PyG batch / edge_index)
# ---------------------------------------------------------------------------
def make_graphs(num_graphs, n):
    src, tgt = [], []
    for g in range(num_graphs):
        off = g * n
        for i in range(n):
            j = (i + 1) % n
            for a, b in ((i, j), (j, i)):           # bidirectional ring edge a -> b
                if g == 1 and b == 0:
                    continue                        # graph 1: local node 0 has in-degree 0
                src.append(off + a)
                tgt.append(off + b)
    adj = np.zeros((num_graphs, n, n), np.float32)
    for a, b in zip(src, tgt):
        adj[b // n, b % n, a % n] = 1.0             # adj[g, i, j] = 1 <=> edge j -> i
    return jnp.array(src, jnp.int32), jnp.array(tgt, jnp.int32), jnp.asarray(adj)


# ---------------------------------------------------------------------------
# independent pure-JAX reference (edge-list scatter softmax, like PyG), in f32
# ---------------------------------------------------------------------------
def _ref_transformer_conv(x, edge_src, edge_tgt, wq, bq, wk, bk, wv, bv, heads, head_dim):
    N = x.shape[0]
    q = (x @ wq + bq).reshape(N, heads, head_dim)
    k = (x @ wk + bk).reshape(N, heads, head_dim)
    v = (x @ wv + bv).reshape(N, heads, head_dim)
    score = jnp.sum(q[edge_tgt] * k[edge_src], axis=-1) / math.sqrt(head_dim)   # [E, heads]
    m = jax.ops.segment_max(score, edge_tgt, num_segments=N)
    e = jnp.exp(score - m[edge_tgt])
    s = jax.ops.segment_sum(e, edge_tgt, num_segments=N)
    alpha = e / s[edge_tgt]
    out = jax.ops.segment_sum(alpha[:, :, None] * v[edge_src], edge_tgt, num_segments=N)
    return out.reshape(N, heads * head_dim)


def dgnr_reference(x, edge_src, edge_tgt, agent_nodes, params, heads, head_dim):
    (we1, be1, we2, be2, wq1, bq1, wk1, bk1, wv1, bv1,
     wq2, bq2, wk2, bk2, wv2, bv2, wqa, wqb, wqc, bqm1, wqm2, bqm2) = params
    h = jax.nn.relu(x @ we1 + be1)
    h = jax.nn.relu(h @ we2 + be2)
    x1 = h[agent_nodes]
    c1 = jax.nn.relu(_ref_transformer_conv(h, edge_src, edge_tgt,
                                           wq1, bq1, wk1, bk1, wv1, bv1, heads, head_dim))
    x2 = c1[agent_nodes]
    c2 = jax.nn.relu(_ref_transformer_conv(c1, edge_src, edge_tgt,
                                           wq2, bq2, wk2, bk2, wv2, bv2, heads, head_dim))
    x3 = c2[agent_nodes]
    cat = jnp.concatenate([x1, x2, x3], axis=1)
    w1 = jnp.concatenate([wqa, wqb, wqc], axis=0)
    qh = jax.nn.relu(cat @ w1 + bqm1)
    return qh @ wqm2 + bqm2


# ---------------------------------------------------------------------------
if __name__ == "__main__":
    input_dim, hidden_dim, heads = 8, 32, 4
    head_dim = hidden_dim
    q_hidden = 64
    num_graphs, nodes_per_graph = 2, 8
    N = num_graphs * nodes_per_graph

    key = jax.random.PRNGKey(0)
    kx, kp = jax.random.split(key)

    x = jax.random.normal(kx, (N, input_dim), jnp.float32)            # obs.x
    edge_src, edge_tgt, adj_graphs = make_graphs(num_graphs, nodes_per_graph)

    # agent node per graph (the "indices" gather): local node 0 of graph 0, local node 1 of graph 1
    agent_local = jnp.array([0, 1], jnp.int32)
    agent_global = agent_local + jnp.arange(num_graphs, dtype=jnp.int32) * nodes_per_graph

    params = make_params(kp, input_dim, hidden_dim, heads, q_hidden)
    kparams = prep_kernel_params(params, heads, head_dim)

    # v5e/v6e: one big grid step (the grid is a serial loop).  On v7x use
    # graphs_per_block = num_graphs // 2 so the "parallel" block axis gives
    # each TensorCore one block.
    graphs_per_block = num_graphs
    x_blocks, adj_blocks, agent_block = block_graphs(
        x, adj_graphs, agent_local, num_graphs, nodes_per_graph, graphs_per_block)

    out = dgnr_forward(x_blocks.astype(jnp.bfloat16),
                       adj_blocks.astype(jnp.bfloat16),
                       agent_block, kparams, heads=heads, head_dim=head_dim)
    out = jax.block_until_ready(out)

    ref = dgnr_reference(x, edge_src, edge_tgt, agent_global, params, heads, head_dim)
    assert out.shape == (num_graphs, 2)
    assert jnp.allclose(out, ref, rtol=5e-2, atol=5e-2), (out, ref)

    print("KERNEL_OK")
</pallas_src>

<mosaic_0001>
module attributes {stable_mosaic.version = 11 : i64} {
  func.func @dgnr_kernel(%arg0: i32, %arg1: memref<2xi32, #tpu.memory_space<smem>>, %arg2: memref<1x16x8xbf16, #tpu.memory_space<vmem>>, %arg3: memref<1x16x16xbf16, #tpu.memory_space<vmem>>, %arg4: memref<8x32xbf16, #tpu.memory_space<vmem>>, %arg5: memref<32x32xbf16, #tpu.memory_space<vmem>>, %arg6: memref<2x32xf32, #tpu.memory_space<vmem>>, %arg7: memref<32x384xbf16, #tpu.memory_space<vmem>>, %arg8: memref<1x384xf32, #tpu.memory_space<vmem>>, %arg9: memref<128x128xbf16, #tpu.memory_space<vmem>>, %arg10: memref<128x256xbf16, #tpu.memory_space<vmem>>, %arg11: memref<1x384xf32, #tpu.memory_space<vmem>>, %arg12: memref<32x64xbf16, #tpu.memory_space<vmem>>, %arg13: memref<256x64xbf16, #tpu.memory_space<vmem>>, %arg14: memref<1x64xf32, #tpu.memory_space<vmem>>, %arg15: memref<64x128xbf16, #tpu.memory_space<vmem>>, %arg16: memref<1x128xf32, #tpu.memory_space<vmem>>, %arg17: memref<1x2x128xf32, #tpu.memory_space<vmem>>) attributes {dimension_semantics = [#tpu.dimension_semantics<parallel>], iteration_bounds = array<i64: 1>, scalar_prefetch = 1 : i64, scratch_operands = 0 : i64, tpu.core_type = #tpu.core_type<tc>, window_params = [{transform_indices = @transform_0, window_bounds = array<i64: 1, 16, 8>}, {transform_indices = @transform_1, window_bounds = array<i64: 1, 16, 16>}, {pipeline_mode = #tpu.pipeline_mode<synchronous>, transform_indices = @transform_2, window_bounds = array<i64: 8, 32>}, {pipeline_mode = #tpu.pipeline_mode<synchronous>, transform_indices = @transform_3, window_bounds = array<i64: 32, 32>}, {pipeline_mode = #tpu.pipeline_mode<synchronous>, transform_indices = @transform_4, window_bounds = array<i64: 2, 32>}, {pipeline_mode = #tpu.pipeline_mode<synchronous>, transform_indices = @transform_5, window_bounds = array<i64: 32, 384>}, {pipeline_mode = #tpu.pipeline_mode<synchronous>, transform_indices = @transform_6, window_bounds = array<i64: 1, 384>}, {pipeline_mode = #tpu.pipeline_mode<synchronous>, transform_indices = @transform_7, window_bounds = array<i64: 128, 128>}, {pipeline_mode = #tpu.pipeline_mode<synchronous>, transform_indices = @transform_8, window_bounds = array<i64: 128, 256>}, {pipeline_mode = #tpu.pipeline_mode<synchronous>, transform_indices = @transform_9, window_bounds = array<i64: 1, 384>}, {pipeline_mode = #tpu.pipeline_mode<synchronous>, transform_indices = @transform_10, window_bounds = array<i64: 32, 64>}, {pipeline_mode = #tpu.pipeline_mode<synchronous>, transform_indices = @transform_11, window_bounds = array<i64: 256, 64>}, {pipeline_mode = #tpu.pipeline_mode<synchronous>, transform_indices = @transform_12, window_bounds = array<i64: 1, 64>}, {pipeline_mode = #tpu.pipeline_mode<synchronous>, transform_indices = @transform_13, window_bounds = array<i64: 64, 128>}, {pipeline_mode = #tpu.pipeline_mode<synchronous>, transform_indices = @transform_14, window_bounds = array<i64: 1, 128>}, {transform_indices = @transform_15, window_bounds = array<i64: 1, 2, 128>}]} {
    %c0 = arith.constant 0 : index
    %c0_0 = arith.constant 0 : index
    %c0_1 = arith.constant 0 : index
    %0 = vector.load %arg3[%c0, %c0_0, %c0_1] : memref<1x16x16xbf16, #tpu.memory_space<vmem>>, vector<1x16x16xbf16>
    %1 = vector.shape_cast %0 : vector<1x16x16xbf16> to vector<16x16xbf16>
    %cst = arith.constant 0.000000e+00 : bf16
    %2 = vector.broadcast %cst : bf16 to vector<16x16xbf16>
    %3 = arith.cmpf ogt, %1, %2 : vector<16x16xbf16>
    %c0_2 = arith.constant 0 : index
    %c0_3 = arith.constant 0 : index
    %c0_4 = arith.constant 0 : index
    %4 = vector.load %arg2[%c0_2, %c0_3, %c0_4] : memref<1x16x8xbf16, #tpu.memory_space<vmem>>, vector<1x16x8xbf16>
    %5 = vector.shape_cast %4 : vector<1x16x8xbf16> to vector<16x8xbf16>
    %c0_5 = arith.constant 0 : index
    %c0_6 = arith.constant 0 : index
    %6 = vector.load %arg4[%c0_5, %c0_6] : memref<8x32xbf16, #tpu.memory_space<vmem>>, vector<8x32xbf16>
    %cst_7 = arith.constant dense<0.000000e+00> : vector<16x32xf32>
    %7 = tpu.matmul %5, %6, %cst_7 {dimension_numbers = #tpu.dot_dimension_numbers<[1], [0], [0], [1], [0, 0, 1, 1], [], []>} : vector<16x8xbf16>, vector<8x32xbf16>, vector<16x32xf32> -> vector<16x32xf32>
    %c0_8 = arith.constant 0 : index
    %c0_9 = arith.constant 0 : index
    %8 = vector.load %arg6[%c0_8, %c0_9] : memref<2x32xf32, #tpu.memory_space<vmem>>, vector<1x32xf32>
    %9 = vector.broadcast %8 : vector<1x32xf32> to vector<16x32xf32>
    %10 = arith.addf %7, %9 : vector<16x32xf32>
    %cst_10 = arith.constant 0.000000e+00 : f32
    %11 = vector.broadcast %cst_10 : f32 to vector<16x32xf32>
    %12 = arith.maximumf %10, %11 : vector<16x32xf32>
    %c0_11 = arith.constant 0 : index
    %c0_12 = arith.constant 0 : index
    %13 = vector.load %arg5[%c0_11, %c0_12] : memref<32x32xbf16, #tpu.memory_space<vmem>>, vector<32x32xbf16>
    %14 = arith.truncf %12 : vector<16x32xf32> to vector<16x32xbf16>
    %cst_13 = arith.constant dense<0.000000e+00> : vector<16x32xf32>
    %15 = tpu.matmul %14, %13, %cst_13 {dimension_numbers = #tpu.dot_dimension_numbers<[1], [0], [0], [1], [0, 0, 1, 1], [], []>} : vector<16x32xbf16>, vector<32x32xbf16>, vector<16x32xf32> -> vector<16x32xf32>
    %c1 = arith.constant 1 : index
    %c0_14 = arith.constant 0 : index
    %16 = vector.load %arg6[%c1, %c0_14] : memref<2x32xf32, #tpu.memory_space<vmem>>, vector<1x32xf32>
    %17 = vector.broadcast %16 : vector<1x32xf32> to vector<16x32xf32>
    %18 = arith.addf %15, %17 : vector<16x32xf32>
    %cst_15 = arith.constant 0.000000e+00 : f32
    %19 = vector.broadcast %cst_15 : f32 to vector<16x32xf32>
    %20 = arith.maximumf %18, %19 : vector<16x32xf32>
    %21 = arith.truncf %20 : vector<16x32xf32> to vector<16x32xbf16>
    %22 = tpu.iota {dimensions = array<i32: 0>} : vector<2x16xi32>
    %23 = tpu.iota {dimensions = array<i32: 1>} : vector<2x16xi32>
    %cst_16 = arith.constant 0.000000e+00 : f32
    %24 = vector.broadcast %cst_16 : f32 to vector<2x16xf32>
    %c2_i32 = arith.constant 2 : i32
    %25 = arith.muli %arg0, %c2_i32 : i32
    %c0_i32 = arith.constant 0 : i32
    %26 = arith.addi %25, %c0_i32 : i32
    %27 = arith.index_cast %26 : i32 to index
    %28 = memref.load %arg1[%27] : memref<2xi32, #tpu.memory_space<smem>>
    %c0_i32_17 = arith.constant 0 : i32
    %29 = vector.broadcast %c0_i32_17 : i32 to vector<2x16xi32>
    %30 = arith.cmpi eq, %22, %29 : vector<2x16xi32>
    %31 = vector.broadcast %28 : i32 to vector<2x16xi32>
    %32 = arith.cmpi eq, %23, %31 : vector<2x16xi32>
    %33 = arith.andi %30, %32 : vector<2x16xi1>
    %cst_18 = arith.constant 1.000000e+00 : f32
    %34 = vector.broadcast %cst_18 : f32 to vector<2x16xf32>
    %35 = arith.select %33, %34, %24 : vector<2x16xi1>, vector<2x16xf32>
    %c2_i32_19 = arith.constant 2 : i32
    %36 = arith.muli %arg0, %c2_i32_19 : i32
    %c1_i32 = arith.constant 1 : i32
    %37 = arith.addi %36, %c1_i32 : i32
    %38 = arith.index_cast %37 : i32 to index
    %39 = memref.load %arg1[%38] : memref<2xi32, #tpu.memory_space<smem>>
    %c1_i32_20 = arith.constant 1 : i32
    %40 = vector.broadcast %c1_i32_20 : i32 to vector<2x16xi32>
    %41 = arith.cmpi eq, %22, %40 : vector<2x16xi32>
    %42 = vector.broadcast %39 : i32 to vector<2x16xi32>
    %43 = arith.cmpi eq, %23, %42 : vector<2x16xi32>
    %44 = arith.andi %41, %43 : vector<2x16xi1>
    %cst_21 = arith.constant 1.000000e+00 : f32
    %45 = vector.broadcast %cst_21 : f32 to vector<2x16xf32>
    %46 = arith.select %44, %45, %35 : vector<2x16xi1>, vector<2x16xf32>
    %47 = arith.truncf %46 : vector<2x16xf32> to vector<2x16xbf16>
    %cst_22 = arith.constant dense<0.000000e+00> : vector<2x32xf32>
    %48 = tpu.matmul %47, %21, %cst_22 {dimension_numbers = #tpu.dot_dimension_numbers<[1], [0], [0], [1], [0, 0, 1, 1], [], []>} : vector<2x16xbf16>, vector<16x32xbf16>, vector<2x32xf32> -> vector<2x32xf32>
    %cst_23 = arith.constant dense<0.000000e+00> : vector<2x16xf32>
    %49 = tpu.matmul %47, %1, %cst_23 {dimension_numbers = #tpu.dot_dimension_numbers<[1], [0], [0], [1], [0, 0, 1, 1], [], []>} : vector<2x16xbf16>, vector<16x16xbf16>, vector<2x16xf32> -> vector<2x16xf32>
    %cst_24 = arith.constant 0.000000e+00 : f32
    %50 = vector.broadcast %cst_24 : f32 to vector<2x16xf32>
    %51 = arith.cmpf ogt, %49, %50 : vector<2x16xf32>
    %c0_25 = arith.constant 0 : index
    %c0_26 = arith.constant 0 : index
    %52 = vector.load %arg7[%c0_25, %c0_26] : memref<32x384xbf16, #tpu.memory_space<vmem>>, vector<32x384xbf16>
    %cst_27 = arith.constant dense<0.000000e+00> : vector<16x384xf32>
    %53 = tpu.matmul %21, %52, %cst_27 {dimension_numbers = #tpu.dot_dimension_numbers<[1], [0], [0], [1], [0, 0, 1, 1], [], []>} : vector<16x32xbf16>, vector<32x384xbf16>, vector<16x384xf32> -> vector<16x384xf32>
    %c0_28 = arith.constant 0 : index
    %c0_29 = arith.constant 0 : index
    %54 = vector.load %arg8[%c0_28, %c0_29] : memref<1x384xf32, #tpu.memory_space<vmem>>, vector<1x384xf32>
    %55 = vector.broadcast %54 : vector<1x384xf32> to vector<16x384xf32>
    %56 = arith.addf %53, %55 : vector<16x384xf32>
    %57 = vector.extract_strided_slice %56 {offsets = [0, 0], sizes = [16, 32], strides = [1, 1]} : vector<16x384xf32> to vector<16x32xf32>
    %58 = vector.extract_strided_slice %56 {offsets = [0, 128], sizes = [16, 32], strides = [1, 1]} : vector<16x384xf32> to vector<16x32xf32>
    %59 = vector.extract_strided_slice %56 {offsets = [0, 256], sizes = [16, 32], strides = [1, 1]} : vector<16x384xf32> to vector<16x32xf32>
    %60 = arith.truncf %57 : vector<16x32xf32> to vector<16x32xbf16>
    %61 = arith.truncf %58 : vector<16x32xf32> to vector<16x32xbf16>
    %cst_30 = arith.constant dense<0.000000e+00> : vector<16x16xf32>
    %62 = tpu.matmul %60, %61, %cst_30 {dimension_numbers = #tpu.dot_dimension_numbers<[1], [1], [0], [0], [0, 0, 1, 0], [], []>} : vector<16x32xbf16>, vector<16x32xbf16>, vector<16x16xf32> -> vector<16x16xf32>
    %cst_31 = arith.constant -1.000000e+30 : f32
    %63 = vector.broadcast %cst_31 : f32 to vector<16x16xf32>
    %64 = arith.select %3, %62, %63 : vector<16x16xi1>, vector<16x16xf32>
    %cst_32 = arith.constant dense<0xFF800000> : vector<16xf32>
    %65 = vector.multi_reduction <maximumf>, %64, %cst_32 [1] : vector<16x16xf32> to vector<16xf32>
    %66 = vector.shape_cast %65 : vector<16xf32> to vector<16x1xf32>
    %67 = vector.broadcast %66 : vector<16x1xf32> to vector<16x16xf32>
    %68 = arith.subf %64, %67 : vector<16x16xf32>
    %69 = math.exp %68 : vector<16x16xf32>
    %cst_33 = arith.constant dense<0.000000e+00> : vector<16xf32>
    %70 = vector.multi_reduction <add>, %69, %cst_33 [1] : vector<16x16xf32> to vector<16xf32>
    %71 = vector.shape_cast %70 : vector<16xf32> to vector<16x1xf32>
    %cst_34 = arith.constant -1.000000e+29 : f32
    %72 = vector.broadcast %cst_34 : f32 to vector<16x1xf32>
    %73 = arith.cmpf ogt, %66, %72 : vector<16x1xf32>
    %74 = tpu.reciprocal %71 : vector<16x1xf32> -> vector<16x1xf32>
    %cst_35 = arith.constant 0.000000e+00 : f32
    %75 = vector.broadcast %cst_35 : f32 to vector<16x1xf32>
    %76 = arith.select %73, %74, %75 : vector<16x1xi1>, vector<16x1xf32>
    %77 = arith.truncf %69 : vector<16x16xf32> to vector<16x16xbf16>
    %78 = arith.truncf %59 : vector<16x32xf32> to vector<16x32xbf16>
    %cst_36 = arith.constant dense<0.000000e+00> : vector<16x32xf32>
    %79 = tpu.matmul %77, %78, %cst_36 {dimension_numbers = #tpu.dot_dimension_numbers<[1], [0], [0], [1], [0, 0, 1, 1], [], []>} : vector<16x16xbf16>, vector<16x32xbf16>, vector<16x32xf32> -> vector<16x32xf32>
    %80 = vector.broadcast %76 : vector<16x1xf32> to vector<16x32xf32>
    %81 = arith.mulf %79, %80 : vector<16x32xf32>
    %82 = vector.extract_strided_slice %56 {offsets = [0, 32], sizes = [16, 32], strides = [1, 1]} : vector<16x384xf32> to vector<16x32xf32>
    %83 = vector.extract_strided_slice %56 {offsets = [0, 160], sizes = [16, 32], strides = [1, 1]} : vector<16x384xf32> to vector<16x32xf32>
    %84 = vector.extract_strided_slice %56 {offsets = [0, 288], sizes = [16, 32], strides = [1, 1]} : vector<16x384xf32> to vector<16x32xf32>
    %85 = arith.truncf %82 : vector<16x32xf32> to vector<16x32xbf16>
    %86 = arith.truncf %83 : vector<16x32xf32> to vector<16x32xbf16>
    %cst_37 = arith.constant dense<0.000000e+00> : vector<16x16xf32>
    %87 = tpu.matmul %85, %86, %cst_37 {dimension_numbers = #tpu.dot_dimension_numbers<[1], [1], [0], [0], [0, 0, 1, 0], [], []>} : vector<16x32xbf16>, vector<16x32xbf16>, vector<16x16xf32> -> vector<16x16xf32>
    %cst_38 = arith.constant -1.000000e+30 : f32
    %88 = vector.broadcast %cst_38 : f32 to vector<16x16xf32>
    %89 = arith.select %3, %87, %88 : vector<16x16xi1>, vector<16x16xf32>
    %cst_39 = arith.constant dense<0xFF800000> : vector<16xf32>
    %90 = vector.multi_reduction <maximumf>, %89, %cst_39 [1] : vector<16x16xf32> to vector<16xf32>
    %91 = vector.shape_cast %90 : vector<16xf32> to vector<16x1xf32>
    %92 = vector.broadcast %91 : vector<16x1xf32> to vector<16x16xf32>
    %93 = arith.subf %89, %92 : vector<16x16xf32>
    %94 = math.exp %93 : vector<16x16xf32>
    %cst_40 = arith.constant dense<0.000000e+00> : vector<16xf32>
    %95 = vector.multi_reduction <add>, %94, %cst_40 [1] : vector<16x16xf32> to vector<16xf32>
    %96 = vector.shape_cast %95 : vector<16xf32> to vector<16x1xf32>
    %cst_41 = arith.constant -1.000000e+29 : f32
    %97 = vector.broadcast %cst_41 : f32 to vector<16x1xf32>
    %98 = arith.cmpf ogt, %91, %97 : vector<16x1xf32>
    %99 = tpu.reciprocal %96 : vector<16x1xf32> -> vector<16x1xf32>
    %cst_42 = arith.constant 0.000000e+00 : f32
    %100 = vector.broadcast %cst_42 : f32 to vector<16x1xf32>
    %101 = arith.select %98, %99, %100 : vector<16x1xi1>, vector<16x1xf32>
    %102 = arith.truncf %94 : vector<16x16xf32> to vector<16x16xbf16>
    %103 = arith.truncf %84 : vector<16x32xf32> to vector<16x32xbf16>
    %cst_43 = arith.constant dense<0.000000e+00> : vector<16x32xf32>
    %104 = tpu.matmul %102, %103, %cst_43 {dimension_numbers = #tpu.dot_dimension_numbers<[1], [0], [0], [1], [0, 0, 1, 1], [], []>} : vector<16x16xbf16>, vector<16x32xbf16>, vector<16x32xf32> -> vector<16x32xf32>
    %105 = vector.broadcast %101 : vector<16x1xf32> to vector<16x32xf32>
    %106 = arith.mulf %104, %105 : vector<16x32xf32>
    %107 = vector.extract_strided_slice %56 {offsets = [0, 64], sizes = [16, 32], strides = [1, 1]} : vector<16x384xf32> to vector<16x32xf32>
    %108 = vector.extract_strided_slice %56 {offsets = [0, 192], sizes = [16, 32], strides = [1, 1]} : vector<16x384xf32> to vector<16x32xf32>
    %109 = vector.extract_strided_slice %56 {offsets = [0, 320], sizes = [16, 32], strides = [1, 1]} : vector<16x384xf32> to vector<16x32xf32>
    %110 = arith.truncf %107 : vector<16x32xf32> to vector<16x32xbf16>
    %111 = arith.truncf %108 : vector<16x32xf32> to vector<16x32xbf16>
    %cst_44 = arith.constant dense<0.000000e+00> : vector<16x16xf32>
    %112 = tpu.matmul %110, %111, %cst_44 {dimension_numbers = #tpu.dot_dimension_numbers<[1], [1], [0], [0], [0, 0, 1, 0], [], []>} : vector<16x32xbf16>, vector<16x32xbf16>, vector<16x16xf32> -> vector<16x16xf32>
    %cst_45 = arith.constant -1.000000e+30 : f32
    %113 = vector.broadcast %cst_45 : f32 to vector<16x16xf32>
    %114 = arith.select %3, %112, %113 : vector<16x16xi1>, vector<16x16xf32>
    %cst_46 = arith.constant dense<0xFF800000> : vector<16xf32>
    %115 = vector.multi_reduction <maximumf>, %114, %cst_46 [1] : vector<16x16xf32> to vector<16xf32>
    %116 = vector.shape_cast %115 : vector<16xf32> to vector<16x1xf32>
    %117 = vector.broadcast %116 : vector<16x1xf32> to vector<16x16xf32>
    %118 = arith.subf %114, %117 : vector<16x16xf32>
    %119 = math.exp %118 : vector<16x16xf32>
    %cst_47 = arith.constant dense<0.000000e+00> : vector<16xf32>
    %120 = vector.multi_reduction <add>, %119, %cst_47 [1] : vector<16x16xf32> to vector<16xf32>
    %121 = vector.shape_cast %120 : vector<16xf32> to vector<16x1xf32>
    %cst_48 = arith.constant -1.000000e+29 : f32
    %122 = vector.broadcast %cst_48 : f32 to vector<16x1xf32>
    %123 = arith.cmpf ogt, %116, %122 : vector<16x1xf32>
    %124 = tpu.reciprocal %121 : vector<16x1xf32> -> vector<16x1xf32>
    %cst_49 = arith.constant 0.000000e+00 : f32
    %125 = vector.broadcast %cst_49 : f32 to vector<16x1xf32>
    %126 = arith.select %123, %124, %125 : vector<16x1xi1>, vector<16x1xf32>
    %127 = arith.truncf %119 : vector<16x16xf32> to vector<16x16xbf16>
    %128 = arith.truncf %109 : vector<16x32xf32> to vector<16x32xbf16>
    %cst_50 = arith.constant dense<0.000000e+00> : vector<16x32xf32>
    %129 = tpu.matmul %127, %128, %cst_50 {dimension_numbers = #tpu.dot_dimension_numbers<[1], [0], [0], [1], [0, 0, 1, 1], [], []>} : vector<16x16xbf16>, vector<16x32xbf16>, vector<16x32xf32> -> vector<16x32xf32>
    %130 = vector.broadcast %126 : vector<16x1xf32> to vector<16x32xf32>
    %131 = arith.mulf %129, %130 : vector<16x32xf32>
    %132 = vector.extract_strided_slice %56 {offsets = [0, 96], sizes = [16, 32], strides = [1, 1]} : vector<16x384xf32> to vector<16x32xf32>
    %133 = vector.extract_strided_slice %56 {offsets = [0, 224], sizes = [16, 32], strides = [1, 1]} : vector<16x384xf32> to vector<16x32xf32>
    %134 = vector.extract_strided_slice %56 {offsets = [0, 352], sizes = [16, 32], strides = [1, 1]} : vector<16x384xf32> to vector<16x32xf32>
    %135 = arith.truncf %132 : vector<16x32xf32> to vector<16x32xbf16>
    %136 = arith.truncf %133 : vector<16x32xf32> to vector<16x32xbf16>
    %cst_51 = arith.constant dense<0.000000e+00> : vector<16x16xf32>
    %137 = tpu.matmul %135, %136, %cst_51 {dimension_numbers = #tpu.dot_dimension_numbers<[1], [1], [0], [0], [0, 0, 1, 0], [], []>} : vector<16x32xbf16>, vector<16x32xbf16>, vector<16x16xf32> -> vector<16x16xf32>
    %cst_52 = arith.constant -1.000000e+30 : f32
    %138 = vector.broadcast %cst_52 : f32 to vector<16x16xf32>
    %139 = arith.select %3, %137, %138 : vector<16x16xi1>, vector<16x16xf32>
    %cst_53 = arith.constant dense<0xFF800000> : vector<16xf32>
    %140 = vector.multi_reduction <maximumf>, %139, %cst_53 [1] : vector<16x16xf32> to vector<16xf32>
    %141 = vector.shape_cast %140 : vector<16xf32> to vector<16x1xf32>
    %142 = vector.broadcast %141 : vector<16x1xf32> to vector<16x16xf32>
    %143 = arith.subf %139, %142 : vector<16x16xf32>
    %144 = math.exp %143 : vector<16x16xf32>
    %cst_54 = arith.constant dense<0.000000e+00> : vector<16xf32>
    %145 = vector.multi_reduction <add>, %144, %cst_54 [1] : vector<16x16xf32> to vector<16xf32>
    %146 = vector.shape_cast %145 : vector<16xf32> to vector<16x1xf32>
    %cst_55 = arith.constant -1.000000e+29 : f32
    %147 = vector.broadcast %cst_55 : f32 to vector<16x1xf32>
    %148 = arith.cmpf ogt, %141, %147 : vector<16x1xf32>
    %149 = tpu.reciprocal %146 : vector<16x1xf32> -> vector<16x1xf32>
    %cst_56 = arith.constant 0.000000e+00 : f32
    %150 = vector.broadcast %cst_56 : f32 to vector<16x1xf32>
    %151 = arith.select %148, %149, %150 : vector<16x1xi1>, vector<16x1xf32>
    %152 = arith.truncf %144 : vector<16x16xf32> to vector<16x16xbf16>
    %153 = arith.truncf %134 : vector<16x32xf32> to vector<16x32xbf16>
    %cst_57 = arith.constant dense<0.000000e+00> : vector<16x32xf32>
    %154 = tpu.matmul %152, %153, %cst_57 {dimension_numbers = #tpu.dot_dimension_numbers<[1], [0], [0], [1], [0, 0, 1, 1], [], []>} : vector<16x16xbf16>, vector<16x32xbf16>, vector<16x32xf32> -> vector<16x32xf32>
    %155 = vector.broadcast %151 : vector<16x1xf32> to vector<16x32xf32>
    %156 = arith.mulf %154, %155 : vector<16x32xf32>
    %157 = tpu.concatenate %81, %106, %131, %156 in 1 : vector<16x32xf32>, vector<16x32xf32>, vector<16x32xf32>, vector<16x32xf32> -> vector<16x128xf32>
    %cst_58 = arith.constant 0.000000e+00 : f32
    %158 = vector.broadcast %cst_58 : f32 to vector<16x128xf32>
    %159 = arith.maximumf %157, %158 : vector<16x128xf32>
    %160 = arith.truncf %159 : vector<16x128xf32> to vector<16x128xbf16>
    %cst_59 = arith.constant dense<0.000000e+00> : vector<2x128xf32>
    %161 = tpu.matmul %47, %160, %cst_59 {dimension_numbers = #tpu.dot_dimension_numbers<[1], [0], [0], [1], [0, 0, 1, 1], [], []>} : vector<2x16xbf16>, vector<16x128xbf16>, vector<2x128xf32> -> vector<2x128xf32>
    %c0_60 = arith.constant 0 : index
    %c0_61 = arith.constant 0 : index
    %162 = vector.load %arg9[%c0_60, %c0_61] : memref<128x128xbf16, #tpu.memory_space<vmem>>, vector<128x128xbf16>
    %163 = arith.truncf %161 : vector<2x128xf32> to vector<2x128xbf16>
    %cst_62 = arith.constant dense<0.000000e+00> : vector<2x128xf32>
    %164 = tpu.matmul %163, %162, %cst_62 {dimension_numbers = #tpu.dot_dimension_numbers<[1], [0], [0], [1], [0, 0, 1, 1], [], []>} : vector<2x128xbf16>, vector<128x128xbf16>, vector<2x128xf32> -> vector<2x128xf32>
    %c0_63 = arith.constant 0 : index
    %c0_64 = arith.constant 0 : index
    %165 = vector.load %arg11[%c0_63, %c0_64] : memref<1x384xf32, #tpu.memory_space<vmem>>, vector<1x128xf32>
    %166 = vector.broadcast %165 : vector<1x128xf32> to vector<2x128xf32>
    %167 = arith.addf %164, %166 : vector<2x128xf32>
    %c0_65 = arith.constant 0 : index
    %c0_66 = arith.constant 0 : index
    %168 = vector.load %arg10[%c0_65, %c0_66] : memref<128x256xbf16, #tpu.memory_space<vmem>>, vector<128x256xbf16>
    %cst_67 = arith.constant dense<0.000000e+00> : vector<16x256xf32>
    %169 = tpu.matmul %160, %168, %cst_67 {dimension_numbers = #tpu.dot_dimension_numbers<[1], [0], [0], [1], [0, 0, 1, 1], [], []>} : vector<16x128xbf16>, vector<128x256xbf16>, vector<16x256xf32> -> vector<16x256xf32>
    %c0_68 = arith.constant 0 : index
    %c128 = arith.constant 128 : index
    %170 = vector.load %arg11[%c0_68, %c128] : memref<1x384xf32, #tpu.memory_space<vmem>>, vector<1x256xf32>
    %171 = vector.broadcast %170 : vector<1x256xf32> to vector<16x256xf32>
    %172 = arith.addf %169, %171 : vector<16x256xf32>
    %173 = vector.extract_strided_slice %167 {offsets = [0, 0], sizes = [2, 32], strides = [1, 1]} : vector<2x128xf32> to vector<2x32xf32>
    %174 = vector.extract_strided_slice %172 {offsets = [0, 0], sizes = [16, 32], strides = [1, 1]} : vector<16x256xf32> to vector<16x32xf32>
    %175 = vector.extract_strided_slice %172 {offsets = [0, 128], sizes = [16, 32], strides = [1, 1]} : vector<16x256xf32> to vector<16x32xf32>
    %176 = arith.truncf %173 : vector<2x32xf32> to vector<2x32xbf16>
    %177 = arith.truncf %174 : vector<16x32xf32> to vector<16x32xbf16>
    %cst_69 = arith.constant dense<0.000000e+00> : vector<2x16xf32>
    %178 = tpu.matmul %176, %177, %cst_69 {dimension_numbers = #tpu.dot_dimension_numbers<[1], [1], [0], [0], [0, 0, 1, 0], [], []>} : vector<2x32xbf16>, vector<16x32xbf16>, vector<2x16xf32> -> vector<2x16xf32>
    %cst_70 = arith.constant -1.000000e+30 : f32
    %179 = vector.broadcast %cst_70 : f32 to vector<2x16xf32>
    %180 = arith.select %51, %178, %179 : vector<2x16xi1>, vector<2x16xf32>
    %cst_71 = arith.constant dense<0xFF800000> : vector<2xf32>
    %181 = vector.multi_reduction <maximumf>, %180, %cst_71 [1] : vector<2x16xf32> to vector<2xf32>
    %182 = vector.shape_cast %181 : vector<2xf32> to vector<2x1xf32>
    %183 = vector.broadcast %182 : vector<2x1xf32> to vector<2x16xf32>
    %184 = arith.subf %180, %183 : vector<2x16xf32>
    %185 = math.exp %184 : vector<2x16xf32>
    %cst_72 = arith.constant dense<0.000000e+00> : vector<2xf32>
    %186 = vector.multi_reduction <add>, %185, %cst_72 [1] : vector<2x16xf32> to vector<2xf32>
    %187 = vector.shape_cast %186 : vector<2xf32> to vector<2x1xf32>
    %cst_73 = arith.constant -1.000000e+29 : f32
    %188 = vector.broadcast %cst_73 : f32 to vector<2x1xf32>
    %189 = arith.cmpf ogt, %182, %188 : vector<2x1xf32>
    %190 = tpu.reciprocal %187 : vector<2x1xf32> -> vector<2x1xf32>
    %cst_74 = arith.constant 0.000000e+00 : f32
    %191 = vector.broadcast %cst_74 : f32 to vector<2x1xf32>
    %192 = arith.select %189, %190, %191 : vector<2x1xi1>, vector<2x1xf32>
    %193 = arith.truncf %185 : vector<2x16xf32> to vector<2x16xbf16>
    %194 = arith.truncf %175 : vector<16x32xf32> to vector<16x32xbf16>
    %cst_75 = arith.constant dense<0.000000e+00> : vector<2x32xf32>
    %195 = tpu.matmul %193, %194, %cst_75 {dimension_numbers = #tpu.dot_dimension_numbers<[1], [0], [0], [1], [0, 0, 1, 1], [], []>} : vector<2x16xbf16>, vector<16x32xbf16>, vector<2x32xf32> -> vector<2x32xf32>
    %196 = vector.broadcast %192 : vector<2x1xf32> to vector<2x32xf32>
    %197 = arith.mulf %195, %196 : vector<2x32xf32>
    %198 = vector.extract_strided_slice %167 {offsets = [0, 32], sizes = [2, 32], strides = [1, 1]} : vector<2x128xf32> to vector<2x32xf32>
    %199 = vector.extract_strided_slice %172 {offsets = [0, 32], sizes = [16, 32], strides = [1, 1]} : vector<16x256xf32> to vector<16x32xf32>
    %200 = vector.extract_strided_slice %172 {offsets = [0, 160], sizes = [16, 32], strides = [1, 1]} : vector<16x256xf32> to vector<16x32xf32>
    %201 = arith.truncf %198 : vector<2x32xf32> to vector<2x32xbf16>
    %202 = arith.truncf %199 : vector<16x32xf32> to vector<16x32xbf16>
    %cst_76 = arith.constant dense<0.000000e+00> : vector<2x16xf32>
    %203 = tpu.matmul %201, %202, %cst_76 {dimension_numbers = #tpu.dot_dimension_numbers<[1], [1], [0], [0], [0, 0, 1, 0], [], []>} : vector<2x32xbf16>, vector<16x32xbf16>, vector<2x16xf32> -> vector<2x16xf32>
    %cst_77 = arith.constant -1.000000e+30 : f32
    %204 = vector.broadcast %cst_77 : f32 to vector<2x16xf32>
    %205 = arith.select %51, %203, %204 : vector<2x16xi1>, vector<2x16xf32>
    %cst_78 = arith.constant dense<0xFF800000> : vector<2xf32>
    %206 = vector.multi_reduction <maximumf>, %205, %cst_78 [1] : vector<2x16xf32> to vector<2xf32>
    %207 = vector.shape_cast %206 : vector<2xf32> to vector<2x1xf32>
    %208 = vector.broadcast %207 : vector<2x1xf32> to vector<2x16xf32>
    %209 = arith.subf %205, %208 : vector<2x16xf32>
    %210 = math.exp %209 : vector<2x16xf32>
    %cst_79 = arith.constant dense<0.000000e+00> : vector<2xf32>
    %211 = vector.multi_reduction <add>, %210, %cst_79 [1] : vector<2x16xf32> to vector<2xf32>
    %212 = vector.shape_cast %211 : vector<2xf32> to vector<2x1xf32>
    %cst_80 = arith.constant -1.000000e+29 : f32
    %213 = vector.broadcast %cst_80 : f32 to vector<2x1xf32>
    %214 = arith.cmpf ogt, %207, %213 : vector<2x1xf32>
    %215 = tpu.reciprocal %212 : vector<2x1xf32> -> vector<2x1xf32>
    %cst_81 = arith.constant 0.000000e+00 : f32
    %216 = vector.broadcast %cst_81 : f32 to vector<2x1xf32>
    %217 = arith.select %214, %215, %216 : vector<2x1xi1>, vector<2x1xf32>
    %218 = arith.truncf %210 : vector<2x16xf32> to vector<2x16xbf16>
    %219 = arith.truncf %200 : vector<16x32xf32> to vector<16x32xbf16>
    %cst_82 = arith.constant dense<0.000000e+00> : vector<2x32xf32>
    %220 = tpu.matmul %218, %219, %cst_82 {dimension_numbers = #tpu.dot_dimension_numbers<[1], [0], [0], [1], [0, 0, 1, 1], [], []>} : vector<2x16xbf16>, vector<16x32xbf16>, vector<2x32xf32> -> vector<2x32xf32>
    %221 = vector.broadcast %217 : vector<2x1xf32> to vector<2x32xf32>
    %222 = arith.mulf %220, %221 : vector<2x32xf32>
    %223 = vector.extract_strided_slice %167 {offsets = [0, 64], sizes = [2, 32], strides = [1, 1]} : vector<2x128xf32> to vector<2x32xf32>
    %224 = vector.extract_strided_slice %172 {offsets = [0, 64], sizes = [16, 32], strides = [1, 1]} : vector<16x256xf32> to vector<16x32xf32>
    %225 = vector.extract_strided_slice %172 {offsets = [0, 192], sizes = [16, 32], strides = [1, 1]} : vector<16x256xf32> to vector<16x32xf32>
    %226 = arith.truncf %223 : vector<2x32xf32> to vector<2x32xbf16>
    %227 = arith.truncf %224 : vector<16x32xf32> to vector<16x32xbf16>
    %cst_83 = arith.constant dense<0.000000e+00> : vector<2x16xf32>
    %228 = tpu.matmul %226, %227, %cst_83 {dimension_numbers = #tpu.dot_dimension_numbers<[1], [1], [0], [0], [0, 0, 1, 0], [], []>} : vector<2x32xbf16>, vector<16x32xbf16>, vector<2x16xf32> -> vector<2x16xf32>
    %cst_84 = arith.constant -1.000000e+30 : f32
    %229 = vector.broadcast %cst_84 : f32 to vector<2x16xf32>
    %230 = arith.select %51, %228, %229 : vector<2x16xi1>, vector<2x16xf32>
    %cst_85 = arith.constant dense<0xFF800000> : vector<2xf32>
    %231 = vector.multi_reduction <maximumf>, %230, %cst_85 [1] : vector<2x16xf32> to vector<2xf32>
    %232 = vector.shape_cast %231 : vector<2xf32> to vector<2x1xf32>
    %233 = vector.broadcast %232 : vector<2x1xf32> to vector<2x16xf32>
    %234 = arith.subf %230, %233 : vector<2x16xf32>
    %235 = math.exp %234 : vector<2x16xf32>
    %cst_86 = arith.constant dense<0.000000e+00> : vector<2xf32>
    %236 = vector.multi_reduction <add>, %235, %cst_86 [1] : vector<2x16xf32> to vector<2xf32>
    %237 = vector.shape_cast %236 : vector<2xf32> to vector<2x1xf32>
    %cst_87 = arith.constant -1.000000e+29 : f32
    %238 = vector.broadcast %cst_87 : f32 to vector<2x1xf32>
    %239 = arith.cmpf ogt, %232, %238 : vector<2x1xf32>
    %240 = tpu.reciprocal %237 : vector<2x1xf32> -> vector<2x1xf32>
    %cst_88 = arith.constant 0.000000e+00 : f32
    %241 = vector.broadcast %cst_88 : f32 to vector<2x1xf32>
    %242 = arith.select %239, %240, %241 : vector<2x1xi1>, vector<2x1xf32>
    %243 = arith.truncf %235 : vector<2x16xf32> to vector<2x16xbf16>
    %244 = arith.truncf %225 : vector<16x32xf32> to vector<16x32xbf16>
    %cst_89 = arith.constant dense<0.000000e+00> : vector<2x32xf32>
    %245 = tpu.matmul %243, %244, %cst_89 {dimension_numbers = #tpu.dot_dimension_numbers<[1], [0], [0], [1], [0, 0, 1, 1], [], []>} : vector<2x16xbf16>, vector<16x32xbf16>, vector<2x32xf32> -> vector<2x32xf32>
    %246 = vector.broadcast %242 : vector<2x1xf32> to vector<2x32xf32>
    %247 = arith.mulf %245, %246 : vector<2x32xf32>
    %248 = vector.extract_strided_slice %167 {offsets = [0, 96], sizes = [2, 32], strides = [1, 1]} : vector<2x128xf32> to vector<2x32xf32>
    %249 = vector.extract_strided_slice %172 {offsets = [0, 96], sizes = [16, 32], strides = [1, 1]} : vector<16x256xf32> to vector<16x32xf32>
    %250 = vector.extract_strided_slice %172 {offsets = [0, 224], sizes = [16, 32], strides = [1, 1]} : vector<16x256xf32> to vector<16x32xf32>
    %251 = arith.truncf %248 : vector<2x32xf32> to vector<2x32xbf16>
    %252 = arith.truncf %249 : vector<16x32xf32> to vector<16x32xbf16>
    %cst_90 = arith.constant dense<0.000000e+00> : vector<2x16xf32>
    %253 = tpu.matmul %251, %252, %cst_90 {dimension_numbers = #tpu.dot_dimension_numbers<[1], [1], [0], [0], [0, 0, 1, 0], [], []>} : vector<2x32xbf16>, vector<16x32xbf16>, vector<2x16xf32> -> vector<2x16xf32>
    %cst_91 = arith.constant -1.000000e+30 : f32
    %254 = vector.broadcast %cst_91 : f32 to vector<2x16xf32>
    %255 = arith.select %51, %253, %254 : vector<2x16xi1>, vector<2x16xf32>
    %cst_92 = arith.constant dense<0xFF800000> : vector<2xf32>
    %256 = vector.multi_reduction <maximumf>, %255, %cst_92 [1] : vector<2x16xf32> to vector<2xf32>
    %257 = vector.shape_cast %256 : vector<2xf32> to vector<2x1xf32>
    %258 = vector.broadcast %257 : vector<2x1xf32> to vector<2x16xf32>
    %259 = arith.subf %255, %258 : vector<2x16xf32>
    %260 = math.exp %259 : vector<2x16xf32>
    %cst_93 = arith.constant dense<0.000000e+00> : vector<2xf32>
    %261 = vector.multi_reduction <add>, %260, %cst_93 [1] : vector<2x16xf32> to vector<2xf32>
    %262 = vector.shape_cast %261 : vector<2xf32> to vector<2x1xf32>
    %cst_94 = arith.constant -1.000000e+29 : f32
    %263 = vector.broadcast %cst_94 : f32 to vector<2x1xf32>
    %264 = arith.cmpf ogt, %257, %263 : vector<2x1xf32>
    %265 = tpu.reciprocal %262 : vector<2x1xf32> -> vector<2x1xf32>
    %cst_95 = arith.constant 0.000000e+00 : f32
    %266 = vector.broadcast %cst_95 : f32 to vector<2x1xf32>
    %267 = arith.select %264, %265, %266 : vector<2x1xi1>, vector<2x1xf32>
    %268 = arith.truncf %260 : vector<2x16xf32> to vector<2x16xbf16>
    %269 = arith.truncf %250 : vector<16x32xf32> to vector<16x32xbf16>
    %cst_96 = arith.constant dense<0.000000e+00> : vector<2x32xf32>
    %270 = tpu.matmul %268, %269, %cst_96 {dimension_numbers = #tpu.dot_dimension_numbers<[1], [0], [0], [1], [0, 0, 1, 1], [], []>} : vector<2x16xbf16>, vector<16x32xbf16>, vector<2x32xf32> -> vector<2x32xf32>
    %271 = vector.broadcast %267 : vector<2x1xf32> to vector<2x32xf32>
    %272 = arith.mulf %270, %271 : vector<2x32xf32>
    %273 = tpu.concatenate %197, %222, %247, %272 in 1 : vector<2x32xf32>, vector<2x32xf32>, vector<2x32xf32>, vector<2x32xf32> -> vector<2x128xf32>
    %cst_97 = arith.constant 0.000000e+00 : f32
    %274 = vector.broadcast %cst_97 : f32 to vector<2x128xf32>
    %275 = arith.maximumf %273, %274 : vector<2x128xf32>
    %276 = tpu.concatenate %161, %275 in 1 : vector<2x128xf32>, vector<2x128xf32> -> vector<2x256xf32>
    %c0_98 = arith.constant 0 : index
    %c0_99 = arith.constant 0 : index
    %277 = vector.load %arg12[%c0_98, %c0_99] : memref<32x64xbf16, #tpu.memory_space<vmem>>, vector<32x64xbf16>
    %278 = arith.truncf %48 : vector<2x32xf32> to vector<2x32xbf16>
    %cst_100 = arith.constant dense<0.000000e+00> : vector<2x64xf32>
    %279 = tpu.matmul %278, %277, %cst_100 {dimension_numbers = #tpu.dot_dimension_numbers<[1], [0], [0], [1], [0, 0, 1, 1], [], []>} : vector<2x32xbf16>, vector<32x64xbf16>, vector<2x64xf32> -> vector<2x64xf32>
    %c0_101 = arith.constant 0 : index
    %c0_102 = arith.constant 0 : index
    %280 = vector.load %arg13[%c0_101, %c0_102] : memref<256x64xbf16, #tpu.memory_space<vmem>>, vector<256x64xbf16>
    %281 = arith.truncf %276 : vector<2x256xf32> to vector<2x256xbf16>
    %cst_103 = arith.constant dense<0.000000e+00> : vector<2x64xf32>
    %282 = tpu.matmul %281, %280, %cst_103 {dimension_numbers = #tpu.dot_dimension_numbers<[1], [0], [0], [1], [0, 0, 1, 1], [], []>} : vector<2x256xbf16>, vector<256x64xbf16>, vector<2x64xf32> -> vector<2x64xf32>
    %283 = arith.addf %279, %282 : vector<2x64xf32>
    %c0_104 = arith.constant 0 : index
    %c0_105 = arith.constant 0 : index
    %284 = vector.load %arg14[%c0_104, %c0_105] : memref<1x64xf32, #tpu.memory_space<vmem>>, vector<1x64xf32>
    %285 = vector.broadcast %284 : vector<1x64xf32> to vector<2x64xf32>
    %286 = arith.addf %283, %285 : vector<2x64xf32>
    %cst_106 = arith.constant 0.000000e+00 : f32
    %287 = vector.broadcast %cst_106 : f32 to vector<2x64xf32>
    %288 = arith.maximumf %286, %287 : vector<2x64xf32>
    %c0_107 = arith.constant 0 : index
    %c0_108 = arith.constant 0 : index
    %289 = vector.load %arg15[%c0_107, %c0_108] : memref<64x128xbf16, #tpu.memory_space<vmem>>, vector<64x128xbf16>
    %290 = arith.truncf %288 : vector<2x64xf32> to vector<2x64xbf16>
    %cst_109 = arith.constant dense<0.000000e+00> : vector<2x128xf32>
    %291 = tpu.matmul %290, %289, %cst_109 {dimension_numbers = #tpu.dot_dimension_numbers<[1], [0], [0], [1], [0, 0, 1, 1], [], []>} : vector<2x64xbf16>, vector<64x128xbf16>, vector<2x128xf32> -> vector<2x128xf32>
    %c0_110 = arith.constant 0 : index
    %c0_111 = arith.constant 0 : index
    %292 = vector.load %arg16[%c0_110, %c0_111] : memref<1x128xf32, #tpu.memory_space<vmem>>, vector<1x128xf32>
    %293 = vector.broadcast %292 : vector<1x128xf32> to vector<2x128xf32>
    %294 = arith.addf %291, %293 : vector<2x128xf32>
    %c0_112 = arith.constant 0 : index
    %c0_113 = arith.constant 0 : index
    %c0_114 = arith.constant 0 : index
    %295 = vector.load %arg17[%c0_112, %c0_113, %c0_114] : memref<1x2x128xf32, #tpu.memory_space<vmem>>, vector<1x2x128xf32>
    %296 = vector.shape_cast %295 : vector<1x2x128xf32> to vector<2x128xf32>
    %297 = vector.shape_cast %294 : vector<2x128xf32> to vector<1x2x128xf32>
    tpu.vector_store %arg17[%c0_112, %c0_113, %c0_114], %297 {strides = array<i32>} : memref<1x2x128xf32, #tpu.memory_space<vmem>>, vector<1x2x128xf32>,
    return
  }
  func.func @transform_0(%arg0: i32, %arg1: memref<2xi32, #tpu.memory_space<smem>>) -> (i32, i32, i32) {
    %c0_i32 = arith.constant 0 : i32
    %c0_i32_0 = arith.constant 0 : i32
    %c0_i32_1 = arith.constant 0 : i32
    return %arg0, %c0_i32, %c0_i32_0 : i32, i32, i32
  }
  func.func @transform_1(%arg0: i32, %arg1: memref<2xi32, #tpu.memory_space<smem>>) -> (i32, i32, i32) {
    %c0_i32 = arith.constant 0 : i32
    %c0_i32_0 = arith.constant 0 : i32
    %c0_i32_1 = arith.constant 0 : i32
    return %arg0, %c0_i32, %c0_i32_0 : i32, i32, i32
  }
  func.func @transform_2(%arg0: i32, %arg1: memref<2xi32, #tpu.memory_space<smem>>) -> (i32, i32) {
    %c0_i32 = arith.constant 0 : i32
    %c0_i32_0 = arith.constant 0 : i32
    %c0_i32_1 = arith.constant 0 : i32
    return %c0_i32, %c0_i32_0 : i32, i32
  }
  func.func @transform_3(%arg0: i32, %arg1: memref<2xi32, #tpu.memory_space<smem>>) -> (i32, i32) {
    %c0_i32 = arith.constant 0 : i32
    %c0_i32_0 = arith.constant 0 : i32
    %c0_i32_1 = arith.constant 0 : i32
    return %c0_i32, %c0_i32_0 : i32, i32
  }
  func.func @transform_4(%arg0: i32, %arg1: memref<2xi32, #tpu.memory_space<smem>>) -> (i32, i32) {
    %c0_i32 = arith.constant 0 : i32
    %c0_i32_0 = arith.constant 0 : i32
    %c0_i32_1 = arith.constant 0 : i32
    return %c0_i32, %c0_i32_0 : i32, i32
  }
  func.func @transform_5(%arg0: i32, %arg1: memref<2xi32, #tpu.memory_space<smem>>) -> (i32, i32) {
    %c0_i32 = arith.constant 0 : i32
    %c0_i32_0 = arith.constant 0 : i32
    %c0_i32_1 = arith.constant 0 : i32
    return %c0_i32, %c0_i32_0 : i32, i32
  }
  func.func @transform_6(%arg0: i32, %arg1: memref<2xi32, #tpu.memory_space<smem>>) -> (i32, i32) {
    %c0_i32 = arith.constant 0 : i32
    %c0_i32_0 = arith.constant 0 : i32
    %c0_i32_1 = arith.constant 0 : i32
    return %c0_i32, %c0_i32_0 : i32, i32
  }
  func.func @transform_7(%arg0: i32, %arg1: memref<2xi32, #tpu.memory_space<smem>>) -> (i32, i32) {
    %c0_i32 = arith.constant 0 : i32
    %c0_i32_0 = arith.constant 0 : i32
    %c0_i32_1 = arith.constant 0 : i32
    return %c0_i32, %c0_i32_0 : i32, i32
  }
  func.func @transform_8(%arg0: i32, %arg1: memref<2xi32, #tpu.memory_space<smem>>) -> (i32, i32) {
    %c0_i32 = arith.constant 0 : i32
    %c0_i32_0 = arith.constant 0 : i32
    %c0_i32_1 = arith.constant 0 : i32
    return %c0_i32, %c0_i32_0 : i32, i32
  }
  func.func @transform_9(%arg0: i32, %arg1: memref<2xi32, #tpu.memory_space<smem>>) -> (i32, i32) {
    %c0_i32 = arith.constant 0 : i32
    %c0_i32_0 = arith.constant 0 : i32
    %c0_i32_1 = arith.constant 0 : i32
    return %c0_i32, %c0_i32_0 : i32, i32
  }
  func.func @transform_10(%arg0: i32, %arg1: memref<2xi32, #tpu.memory_space<smem>>) -> (i32, i32) {
    %c0_i32 = arith.constant 0 : i32
    %c0_i32_0 = arith.constant 0 : i32
    %c0_i32_1 = arith.constant 0 : i32
    return %c0_i32, %c0_i32_0 : i32, i32
  }
  func.func @transform_11(%arg0: i32, %arg1: memref<2xi32, #tpu.memory_space<smem>>) -> (i32, i32) {
    %c0_i32 = arith.constant 0 : i32
    %c0_i32_0 = arith.constant 0 : i32
    %c0_i32_1 = arith.constant 0 : i32
    return %c0_i32, %c0_i32_0 : i32, i32
  }
  func.func @transform_12(%arg0: i32, %arg1: memref<2xi32, #tpu.memory_space<smem>>) -> (i32, i32) {
    %c0_i32 = arith.constant 0 : i32
    %c0_i32_0 = arith.constant 0 : i32
    %c0_i32_1 = arith.constant 0 : i32
    return %c0_i32, %c0_i32_0 : i32, i32
  }
  func.func @transform_13(%arg0: i32, %arg1: memref<2xi32, #tpu.memory_space<smem>>) -> (i32, i32) {
    %c0_i32 = arith.constant 0 : i32
    %c0_i32_0 = arith.constant 0 : i32
    %c0_i32_1 = arith.constant 0 : i32
    return %c0_i32, %c0_i32_0 : i32, i32
  }
  func.func @transform_14(%arg0: i32, %arg1: memref<2xi32, #tpu.memory_space<smem>>) -> (i32, i32) {
    %c0_i32 = arith.constant 0 : i32
    %c0_i32_0 = arith.constant 0 : i32
    %c0_i32_1 = arith.constant 0 : i32
    return %c0_i32, %c0_i32_0 : i32, i32
  }
  func.func @transform_15(%arg0: i32, %arg1: memref<2xi32, #tpu.memory_space<smem>>) -> (i32, i32, i32) {
    %c0_i32 = arith.constant 0 : i32
    %c0_i32_0 = arith.constant 0 : i32
    %c0_i32_1 = arith.constant 0 : i32
    return %arg0, %c0_i32, %c0_i32_0 : i32, i32, i32
  }
}

</mosaic_0001>

<bundles_post_ra>
// kernel: tpu_custom_call.1
= control target key start
LH: loop header
LB: loop body
LE: loop exit
PB: predicated region body
PF: predicated region fallthrough
CT: control target
= control target key end

     0   :  { %s3579_s0 = inlined_call_operand.vmem [shape: s32[2], index: 0, kind: input, shape index: {}]   ;;  %s3580_s1 = inlined_call_operand.vmem [shape: bf16[1,16,8], index: 1, kind: input, shape index: {}]   ;;  %s3581_s2 = inlined_call_operand.hbm [shape: bf16[1,16,16], index: 2, kind: input, shape index: {}]   ;;  %s3582_s3 = inlined_call_operand.hbm [shape: bf16[8,32], index: 3, kind: input, shape index: {}]   ;;  %s3583_s4 = inlined_call_operand.hbm [shape: bf16[32,32], index: 4, kind: input, shape index: {}]   ;;  %s3584_s5 = inlined_call_operand.hbm [shape: f32[2,32], index: 5, kind: input, shape index: {}]   ;;  %s3585_s6 = inlined_call_operand.hbm [shape: bf16[32,384], index: 6, kind: input, shape index: {}]   ;;  %s3586_s7 = inlined_call_operand.hbm [shape: f32[1,384], index: 7, kind: input, shape index: {}]   ;;  %s3587_s8 = inlined_call_operand.vmem [shape: bf16[128,128], index: 8, kind: input, shape index: {}]   ;;  %s3588_s9 = inlined_call_operand.vmem [shape: bf16[128,256], index: 9, kind: input, shape index: {}]   ;;  %s3589_s10 = inlined_call_operand.hbm [shape: f32[1,384], index: 10, kind: input, shape index: {}]   ;;  %s3590_s11 = inlined_call_operand.vmem [shape: bf16[32,64], index: 11, kind: input, shape index: {}]   ;;  %s3591_s12 = inlined_call_operand.vmem [shape: bf16[256,64], index: 12, kind: input, shape index: {}]   ;;  %s3592_s13 = inlined_call_operand.vmem [shape: f32[1,64], index: 13, kind: input, shape index: {}]   ;;  %s3593_s14 = inlined_call_operand.vmem [shape: bf16[64,128], index: 14, kind: input, shape index: {}]   ;;  %s3594_s15 = inlined_call_operand.vmem [shape: f32[1,128], index: 15, kind: input, shape index: {}]   ;;  %s3595_s16 = inlined_call_operand.hbm [shape: f32[1,2,128], index: 16, kind: output, shape index: {}]  }
   0x1   :  { %3597 = sst [smem:[#allocation23_spill]] %s3579_s0 }
   0x2   :  { %3598 = sst [smem:[#allocation24_spill]] %s3588_s9  ;;  %s3599_s23 = sld [smem:[#allocation23_spill]] }
   0x8   :  { %s21_s9 = sshll.u32 %s3599_s23, 4  ;;  %s22_s9 = int_to_ptr.vmem [resolvable:$true] %s21_s9 }
   0x9   :  { %s2686_s24 = scalar_lea.vmem %s22_s9, 16  ;;  %p2691_p1 = scmp.lt.s32.totalorder %s22_s9, %s22_s9 }
   0xa   :  { %p2687_p0 = scmp.ne.s32.totalorder %s22_s9, %s2686_s24  ;;  %p2692_p2 = scmp.lt.s32.totalorder %s2686_s24, %s2686_s24 }
   0xc   :  { %p2693_p3 = por %p2692_p2, %p2691_p1 }
   0xe   :  { %p2694_p4 = pnand %p2693_p3, %p2687_p0 }
  0x10   :  { %2697 = shalt.err (!%p2694_p4)  }
  0x11   :  { %s2886_s25 = smov [#allocation3]  }
  0x12   :  { %24 = dma.vmem_to_smem %s22_s9, 16, %s2886_s25, [#allocation2] }
  0x13   :  { %2874 = dma.done.wait [#allocation2], 16 }
  0x14   :  { %2875 = vsyncadd [#allocation2], 4294967280 }
  0x15   :  { %26 = sfence }
  0x16   :  { %27 = vsyncpa [#allocation5], 0 }
  0x17   :  { %28 = vsyncpa [#allocation8], 0 }
  0x18   :  { %29 = vsyncpa [#allocation11], 0 }
  0x19   :  { %30 = vsyncpa [#allocation14], 0 }
  0x1a   :  { %31 = vsyncpa [#allocation6], 0  ;;  %s2887_s26 = smov [#allocation7]   ;;  %s2888_s28 = smov [#allocation10]  }
  0x1b   :  { %s52_s27 = sshll.u32 %s2887_s26, 4  ;;  %s74_s29 = sshll.u32 %s2888_s28, 4  ;;  %s53_s27 = int_to_ptr.vmem [resolvable:$true] %s52_s27  ;;  %s75_s29 = int_to_ptr.vmem [resolvable:$true] %s74_s29 }
  0x1c   :  { %s2698_s17 = scalar_lea.hbm %s3582_s3, 64 }
  0x1d   :  { %p2699_p5 = scmp.ne.s32.totalorder %s3582_s3, %s2698_s17  ;;  %p2702_p6 = scmp.lt.u32.totalorder %s2698_s17, %s3582_s3 }
  0x1f   :  { %p2704_p7 = pnand %p2702_p6, %p2699_p5 }
  0x21   :  { %2707 = shalt.err (!%p2704_p7)
}
  0x22   :  { %s2708_s21 = scalar_lea.vmem %s53_s27, 64  ;;  %p2713_p9 = scmp.lt.s32.totalorder %s53_s27, %s53_s27 }
  0x23   :  { %p2709_p8 = scmp.ne.s32.totalorder %s53_s27, %s2708_s21  ;;  %p2714_p10 = scmp.lt.s32.totalorder %s2708_s21, %s2708_s21 }
  0x25   :  { %p2715_p11 = por %p2714_p10, %p2713_p9 }
  0x27   :  { %p2716_p12 = pnand %p2715_p11, %p2709_p8 }
  0x29   :  { %2719 = shalt.err (!%p2716_p12)
}
  0x2a   :  { %55 = dma.hbm_to_vmem [thread:$0]  %s3582_s3, 64, %s53_s27, [#allocation8]  }
  0x2b   :  { %s2720_s26 = scalar_lea.hbm %s3584_s5, 32 }
  0x2c   :  { %p2721_p13 = scmp.ne.s32.totalorder %s3584_s5, %s2720_s26  ;;  %p2724_p0 = scmp.lt.u32.totalorder %s2720_s26, %s3584_s5 }
  0x2e   :  { %p2726_p1 = pnand %p2724_p0, %p2721_p13 }
  0x30   :  { %2729 = shalt.err (!%p2726_p1)
}
  0x31   :  { %s2730_s18 = scalar_lea.vmem %s75_s29, 32  ;;  %p2735_p3 = scmp.lt.s32.totalorder %s75_s29, %s75_s29 }
  0x32   :  { %p2731_p2 = scmp.ne.s32.totalorder %s75_s29, %s2730_s18  ;;  %p2736_p4 = scmp.lt.s32.totalorder %s2730_s18, %s2730_s18 }
  0x34   :  { %p2737_p5 = por %p2736_p4, %p2735_p3 }
  0x36   :  { %p2738_p6 = pnand %p2737_p5, %p2731_p2 }
  0x38   :  { %2741 = shalt.err (!%p2738_p6)
}
  0x39   :  { %77 = dma.hbm_to_vmem [thread:$0]  %s3584_s5, 32, %s75_s29, [#allocation11]  }
  0x3a   :  { %s2889_s9 = smov [#allocation13]   ;;  %s2890_s20 = smov [#allocation4]  }
  0x3b   :  { %s96_s19 = sshll.u32 %s2889_s9, 4  ;;  %s39_s21 = sshll.u32 %s2890_s20, 4  ;;  %s97_s19 = int_to_ptr.vmem [resolvable:$true] %s96_s19  ;;  %s3016_s21 = int_to_ptr.vmem [resolvable:$true] %s39_s21 }
  0x3c   :  { %s2742_s24 = scalar_lea.hbm %s3586_s7, 48 }
  0x3d   :  { %p2743_p7 = scmp.ne.s32.totalorder %s3586_s7, %s2742_s24  ;;  %p2746_p8 = scmp.lt.u32.totalorder %s2742_s24, %s3586_s7 }
  0x3f   :  { %p2748_p9 = pnand %p2746_p8, %p2743_p7 }
  0x41   :  { %2751 = shalt.err (!%p2748_p9)
}
  0x42   :  { %s2752_s5 = scalar_lea.vmem %s97_s19, 48  ;;  %s2756_s29 = scalar_lea.vmem %s97_s19, 64 }
  0x43   :  { %p2753_p10 = scmp.ne.s32.totalorder %s97_s19, %s2752_s5  ;;  %p2757_p11 = scmp.lt.s32.totalorder %s97_s19, %s97_s19 }
  0x44   :  { %p2758_p12 = scmp.lt.s32.totalorder %s2756_s29, %s2752_s5 }
  0x46   :  { %p2759_p13 = por %p2758_p12, %p2757_p11 }
  0x48   :  { %p2760_p0 = pnand %p2759_p13, %p2753_p10 }
  0x4a   :  { %2763 = shalt.err (!%p2760_p0)
}
  0x4b   :  { %99 = dma.hbm_to_vmem [thread:$0]  %s3586_s7, 48, %s97_s19, [#allocation14]  }
  0x4c   :  { %s2764_s27 = scalar_lea.hbm %s3581_s2, 128 }
  0x4d   :  { %p2765_p1 = scmp.ne.s32.totalorder %s3581_s2, %s2764_s27  ;;  %p2768_p2 = scmp.lt.u32.totalorder %s2764_s27, %s3581_s2 }
  0x4f   :  { %p2770_p3 = pnand %p2768_p2, %p2765_p1 }
  0x51   :  { %2773 = shalt.err (!%p2770_p3)
}
  0x52   :  { %s2774_s24 = scalar_lea.vmem %s3016_s21, 128  ;;  %p2779_p5 = scmp.lt.s32.totalorder %s3016_s21, %s3016_s21 }
  0x53   :  { %p2775_p4 = scmp.ne.s32.totalorder %s3016_s21, %s2774_s24  ;;  %p2780_p6 = scmp.lt.s32.totalorder %s2774_s24, %s2774_s24 }
  0x55   :  { %p2781_p7 = por %p2780_p6, %p2779_p5 }
  0x57   :  { %p2782_p8 = pnand %p2781_p7, %p2775_p4 }
  0x59   :  { %2785 = shalt.err (!%p2782_p8)
}
  0x5a   :  { %s2891_s7 = smov 64   ;;  %s2892_s19 = smov 4  }
  0x5b   :  { %45 = dma.hbm_to_vmem [thread:$0]  %s3581_s2, 128, %s3016_s21, [#allocation5], %s2891_s7, %s2891_s7, %s2892_s19  }
  0x5c   :  { %s2893_s28 = smov [#allocation9]   ;;  %s2894_s5 = smov [#allocation12]  }
  0x5d   :  { %s61_s30 = sshll.u32 %s2893_s28, 4  ;;  %s83_s29 = sshll.u32 %s2894_s5, 4  ;;  %s62_s30 = int_to_ptr.vmem [resolvable:$true] %s61_s30  ;;  %s3049_s29 = int_to_ptr.vmem [resolvable:$true] %s83_s29 }
  0x5e   :  { %s2786_s18 = scalar_lea.hbm %s3583_s4, 256 }
  0x5f   :  { %p2787_p9 = scmp.ne.s32.totalorder %s3583_s4, %s2786_s18  ;;  %p2790_p10 = scmp.lt.u32.totalorder %s2786_s18, %s3583_s4 }
  0x61   :  { %p2792_p11 = pnand %p2790_p10, %p2787_p9 }
  0x63   :  { %2795 = shalt.err (!%p2792_p11)
}
  0x64   :  { %s2796_s2 = scalar_lea.vmem %s62_s30, 256  ;;  %p2801_p13 = scmp.lt.s32.totalorder %s62_s30, %s62_s30 }
  0x65   :  { %p2797_p12 = scmp.ne.s32.totalorder %s62_s30, %s2796_s2  ;;  %p2802_p0 = scmp.lt.s32.totalorder %s2796_s2, %s2796_s2 }
  0x67   :  { %p2803_p1 = por %p2802_p0, %p2801_p13 }
  0x69   :  { %p2804_p2 = pnand %p2803_p1, %p2797_p12 }
  0x6b   :  { %2807 = shalt.err (!%p2804_p2)
}
  0x6c   :  { %67 = dma.hbm_to_vmem [thread:$0]  %s3583_s4, 256, %s62_s30, [#allocation8], %s2891_s7, %s2891_s7, %s2892_s19  }
  0x6d   :  { %s2808_s25 = scalar_lea.hbm %s3585_s6, 768 }
  0x6e   :  { %p2809_p3 = scmp.ne.s32.totalorder %s3585_s6, %s2808_s25  ;;  %p2812_p4 = scmp.lt.u32.totalorder %s2808_s25, %s3585_s6 }
  0x70   :  { %p2814_p5 = pnand %p2812_p4, %p2809_p3 }
  0x72   :  { %2817 = shalt.err (!%p2814_p5)
}
  0x73   :  { %s2818_s17 = scalar_lea.vmem %s3049_s29, 768  ;;  %p2823_p7 = scmp.lt.s32.totalorder %s3049_s29, %s3049_s29 }
  0x74   :  { %p2819_p6 = scmp.ne.s32.totalorder %s3049_s29, %s2818_s17  ;;  %p2824_p8 = scmp.lt.s32.totalorder %s2818_s17, %s2818_s17 }
  0x76   :  { %p2825_p9 = por %p2824_p8, %p2823_p7 }
  0x78   :  { %p2826_p10 = pnand %p2825_p9, %p2819_p6 }
  0x7a   :  { %2829 = shalt.err (!%p2826_p10)
}
  0x7b   :  { %s2895_s4 = smov 192   ;;  %s2896_s19 = smov 12  }
  0x7c   :  { %89 = dma.hbm_to_vmem [thread:$0]  %s3585_s6, 768, %s3049_s29, [#allocation11], %s2895_s4, %s2895_s4, %s2896_s19  }
  0x7d   :  { %s2897_s3 = smov [#allocation15]   ;;  %s2830_s2 = scalar_lea.hbm %s3589_s10, 48 }
  0x7e   :  { %s110_s27 = sshll.u32 %s2897_s3, 4  ;;  %p2831_p11 = scmp.ne.s32.totalorder %s3589_s10, %s2830_s2  ;;  %s111_s27 = int_to_ptr.vmem [resolvable:$true] %s110_s27 }
  0x7f   :  { %p2834_p12 = scmp.lt.u32.totalorder %s2830_s2, %s3589_s10 }
  0x81   :  { %p2836_p13 = pnand %p2834_p12, %p2831_p11 }
  0x83   :  { %2839 = shalt.err (!%p2836_p13)
}
  0x84   :  { %s2840_s25 = scalar_lea.vmem %s111_s27, 48  ;;  %s2844_s6 = scalar_lea.vmem %s111_s27, 64 }
  0x85   :  { %p2841_p0 = scmp.ne.s32.totalorder %s111_s27, %s2840_s25  ;;  %p2845_p1 = scmp.lt.s32.totalorder %s111_s27, %s111_s27 }
  0x86   :  { %p2846_p2 = scmp.lt.s32.totalorder %s2844_s6, %s2840_s25 }
  0x88   :  { %p2847_p3 = por %p2846_p2, %p2845_p1 }
  0x8a   :  { %p2848_p4 = pnand %p2847_p3, %p2841_p0 }
  0x8c   :  { %2851 = shalt.err (!%p2848_p4)
}
  0x8d   :  { %113 = dma.hbm_to_vmem [thread:$0]  %s3589_s10, 48, %s111_s27, [#allocation14]  }
  0x8e   :  { %2876 = dma.done.wait [#allocation5], 128  }
  0x8f   :  { %2877 = vsyncadd [#allocation5], 4294967168 }
  0x90   :  { %2878 = dma.done.wait [#allocation8], 320  }
  0x91   :  { %2879 = vsyncadd [#allocation8], 4294966976 }
  0x92   :  { %2880 = dma.done.wait [#allocation11], 800  }
  0x93   :  { %2881 = vsyncadd [#allocation11], 4294966496 }
  0x94   :  { %2882 = dma.done.wait [#allocation14], 96  }
  0x95   :  { %2883 = vsyncadd [#allocation14], 4294967200  ;;  %v2898_v0 = vmov 0.0   ;;  %vm2899_vm0 = vmmov 0   ;;  %vm169_vm1 = vcmask 1043456   ;;  %v2572_v3 = vld [vmem:[%s3580_s1] sm:$0xff]   ;;  %v286_v19 = vlaneseq }
  0x96   :  { %2363 = vmatprep.subr.bf16.mxu0 %v2898_v0  ;;  %2365 = vmatprep.mubr.msk.bf16.mxu0 %vm2899_vm0, %v2898_v0  ;;  %v154_v1 = vld [vmem:[#allocation7] sm:$0xf]  ;;  %vm165_vm2 = vcmask 64512   ;;  %v2573_v4 = vld [vmem:[#allocation9] sm:$0xff]   ;;  %v2574_v5 = vld [vmem:[#allocation9 + $0x8] sm:$0xff]   ;;  %vm238_vm3 = vcmask 261120  }
  0x97   :  { %2369 = vmatprep.subr.bf16.mxu1 %v2898_v0  ;;  %2373 = vmatprep.mubr.msk.bf16.mxu1 %vm2899_vm0, %v2898_v0  ;;  %v171_v2 = vsel %vm169_vm1, %v154_v1, 0  ;;  %v2191_v6 = vld [vmem:[#allocation10] ss:$0 sm:$0xff]  ;;  %v3108_v13 = vld [vmem:[#allocation4] sm:$0xf]  ;;  %s291_s1 = sld [smem:[#allocation3]] }
  0x98   :  { %2364 = vmatpush3.bf16.msra.mxu0 %v171_v2  ;;  %2370 = vmatpush3.bf16.msra.mxu1 %v2573_v4  ;;  %v3110_v14 = vld [vmem:[#allocation4 + $0x4] sm:$0xf]  ;;  %s2198_s5 = sld [smem:[#allocation3 + $0x1]]  ;;  %v3118_v20 = vshrl.u32 %v286_v19, 7  ;;  %v289_v21 = vand.u32 127, %v286_v19  ;;  %vm305_vm10 = vcmask 130048  }
  0x99   :  { %2377 = vmatprep.subr.bf16.mxu0 %v2898_v0  ;;  %2371 = vmatprep.subr.bf16.mxu1 %v2898_v0  ;;  %v2200_v17 = vcombine.low %v3108_v13, %v3110_v14  ;;  %v2576_v27 = vld [vmem:[#allocation12 + $0x8] ss:$12 sps:$4 sm:$0xff]   ;;  %v2577_v28 = vld [vmem:[#allocation12 + $0x20] ss:$12 sps:$4 sm:$0xff]   ;;  %v2194_v29 = vld [vmem:[#allocation10 + $0x1] ss:$0 sm:$0xff] }
  0x9a   :  { %vm292_vm4 = vcmp.eq.s32.totalorder %v3118_v20, 0  ;;  %vm299_vm7 = vcmp.eq.s32.totalorder %v3118_v20, 1  ;;  %v2580_v38 = vld [vmem:[#allocation12 + $0x4] ss:$12 sps:$4 sm:$0xff]   ;;  %v2578_v40 = vld [vmem:[#allocation12] ss:$12 sps:$4 sm:$0xff]  }
  0x9b   :  { %2366 = vmatmul.mubr.msk.bf16.vlgmr.msra.gmra.mrb[0].mxu0 %vm165_vm2, %v2572_v3  ;;  %v2583_v41 = vld [vmem:[#allocation12 + $0x1c] ss:$12 sps:$4 sm:$0xff]   ;;  %v2581_v42 = vld [vmem:[#allocation12 + $0x18] ss:$12 sps:$4 sm:$0xff]   ;;  %v2900_v43 = vmov 0   ;;  %v416_v48 = vsub.s32 2, %v3118_v20 }
  0x9c   :  { %2379 = vmatprep.mubr.msk.bf16.mxu0 %vm2899_vm0, %v2898_v0  ;;  %2372 = vmatpush3.bf16.msra.mxu1 %v2574_v5  ;;  %v404_v49 = vld [vmem:[#allocation13] sm:$0x7]  ;;  %v408_v62 = vsub.s32 0, %v3118_v20  ;;  %v412_v63 = vsub.s32 1, %v3118_v20  ;;  %s2901_s0 = smov 96   ;;  %s2902_s17 = smov 32  }
  0x9d   :  { %2383 = vmatprep.subr.bf16.mxu1 %v2898_v0  ;;  %v293_v22 = vstv %s291_s1  ;;  %v417_v50 = vrot.slane %v404_v49, %v416_v48  ;;  %vm150_vm11 = vcmp.gt.bf16.partialorder %v3108_v13, 0  ;;  %vm151_vm12 = vcmp.gt.bf16.partialorder %v3110_v14, 0  ;;  %s3604_s26 = sld [smem:[#allocation24_spill]]  ;;  %v2219_v20 = vld [vmem:[#allocation15] ss:$0 sm:$0xff] }
  0x9e   :  { %vm294_vm5 = vcmp.eq.s32.totalorder %v289_v21, %v293_v22  ;;  %v300_v23 = vstv %s2198_s5  ;;  %v409_v1 = vrot.slane %v404_v49, %v408_v62  ;;  %v413_v3 = vrot.slane %v404_v49, %v412_v63 }
  0x9f   :  { %vm295_vm6 = vmand %vm292_vm4, %vm294_vm5  ;;  %vm301_vm8 = vcmp.eq.s32.totalorder %v289_v21, %v300_v23 }
  0xa0   :  { %v296_v24 = vsel %vm295_vm6, 1.0, %v2898_v0  ;;  %vm302_vm9 = vmand %vm299_vm7, %vm301_vm8 }
  0xa1   :  { %v303_v25 = vsel %vm302_vm9, 1.0, %v296_v24  ;;  %vm1079_vm9 = vcmask 523264  }
  0xa2   :  { %v3123_v26 = vpack.c.bf16 %v303_v25, %v303_v25 }
 0x16e   :  { %v207_v7 = vpop.f32.mrb[0].mxu0 }
 0x16f   :  { %v208_v8 = vadd.f32 %v2191_v6, %v207_v7  ;;  %v2367_v9 = vpop.f32.mrb[1].mxu0 }
 0x170   :  { %v210_v10 = vpop.f32.mrb[2].mxu0 }
 0x171   :  { %v211_v11 = vadd.f32 %v2191_v6, %v210_v10  ;;  %v2368_v12 = vpop.f32.mrb[3].mxu0  ;;  %v214_v15 = vmax.f32 %v208_v8, 0.0 }
 0x173   :  { %v215_v16 = vmax.f32 %v211_v11, 0.0 }
 0x175   :  { %v220_v18 = vpack.c.bf16 %v215_v16, %v214_v15 }
 0x177   :  { %2374 = vmatmul.mubr.msk.bf16.vlgmr.msra.gmra.mrb[0].mxu1 %vm238_vm3, %v220_v18 }
 0x178   :  { %2384 = vmatpush3.bf16.msra.mxu1 %v2200_v17  ;;  %2385 = vmatprep.mubr.msk.bf16.mxu1 %vm2899_vm0, %v2898_v0 }
 0x179   :  { %2389 = vmatprep.subr.bf16.mxu1 %v2898_v0 }
 0x17f   :  { %2386 = vmatmul.mubr.msk.bf16.vlgmr.msra.gmra.mrb[4].mxu1 %vm305_vm10, %v3123_v26 }
 0x180   :  { %2390 = vmatpush3.bf16.msra.mxu1 %v2576_v27  ;;  %2393 = vmatprep.mubr.msk.bf16.mxu1 %vm2899_vm0, %v2898_v0  ;;  %v589_v27 = vsel %vm150_vm11, 65537, %v2900_v43  ;;  %vm1082_vm11 = vcmask 785408  }
 0x181   :  { %2391 = vmatprep.subr.bf16.mxu1 %v2898_v0 }
 0x184   :  { %2392 = vmatpush3.bf16.msra.mxu1 %v2577_v28  ;;  %v590_v28 = vsel %vm151_vm12, 65537, %v2900_v43  ;;  %vm1440_vm12 = vcmask 123904  }
 0x185   :  { %2403 = vmatprep.subr.bf16.mxu1 %v2898_v0 }
 0x24a   :  { %v276_v30 = vpop.f32.mrb[0].mxu1 }
 0x24b   :  { %v277_v31 = vadd.f32 %v2194_v29, %v276_v30  ;;  %v2375_v32 = vpop.f32.mrb[1].mxu1  ;;  %v592_v30 = vunpack.c.l.b16 %v590_v28 }
 0x24c   :  { %v279_v33 = vpop.f32.mrb[2].mxu1 }
 0x24d   :  { %v280_v34 = vadd.f32 %v2194_v29, %v279_v33  ;;  %v2376_v35 = vpop.f32.mrb[3].mxu1  ;;  %v283_v36 = vmax.f32 %v277_v31, 0.0  ;;  %v591_v29 = vunpack.c.l.b16 %v589_v27  ;;  %vm3190_vm14 = vcmp.ne.s32.totalorder %v592_v30, 0 }
 0x24f   :  { %v284_v37 = vmax.f32 %v280_v34, 0.0  ;;  %vm3186_vm13 = vcmp.ne.s32.totalorder %v591_v29, 0 }
 0x251   :  { %v285_v39 = vpack.c.bf16 %v284_v37, %v283_v36 }
 0x252   :  { %v3141_v44 = vpop.f32.mrb[4].mxu1 }
 0x253   :  { %2378 = vmatpush3.bf16.msra.mxu0 %v285_v39  ;;  %2394 = vmatmul.mubr.msk.bf16.vlgmr.msra.gmra.mrb[8].mxu1 %vm238_vm3, %v285_v39  ;;  %v2387_v45 = vpop.f32.mrb[5].mxu1 }
 0x254   :  { %456 = vmatprep.subr.bf16.mxu0 %v2580_v38  ;;  %2405 = vmatprep.mubr.msk.bf16.mxu1 %vm2899_vm0, %v2898_v0  ;;  %v392_v46 = vpop.f32.mrb[6].mxu1 }
 0x255   :  { %v2388_v47 = vpop.f32.mrb[7].mxu1 }
 0x256   :  { %2380 = vmatmul.mubr.msk.bf16.vlgmr.msra.gmra.mrb[4].mxu0 %vm305_vm10, %v3123_v26 }
 0x257   :  { %457 = vmatpush1.bf16.msra.mxu0 %v2578_v40  ;;  %488 = vmatprep.mubr.bf16.mxu0 %v2900_v43 }
 0x258   :  { %458 = vmatprep.subr.bf16.mxu0 %v2583_v41 }
 0x25b   :  { %459 = vmatpush1.bf16.msra.mxu0 %v2581_v42 }
 0x25c   :  { %2397 = vmatprep.subr.bf16.mxu0 %v2898_v0 }
 0x25e   :  { %2208 = vmatmul.mubr.msk.bf16.vlgmr.msra.gmra.mrb[8].mxu0 %vm238_vm3, %v285_v39 }
 0x25f   :  { %2399 = vmatprep.mubr.msk.bf16.mxu0 %vm2899_vm0, %v2898_v0 }
 0x326   :  { %v533_v51 = vpop.f32.mrb[8].mxu1 }
 0x327   :  { %v2395_v52 = vpop.f32.mrb[9].mxu1  ;;  %v534_v54 = vadd.f32 %v533_v51, %v417_v50 }
 0x328   :  { %v536_v53 = vpop.f32.mrb[10].mxu1 }
 0x329   :  { %v537_v55 = vadd.f32 %v536_v53, %v417_v50  ;;  %v3144_v56 = vpop.f32.mrb[4].mxu0  ;;  %v2396_v57 = vpop.f32.mrb[11].mxu1 }
 0x32a   :  { %v2381_v58 = vpop.f32.mrb[5].mxu0 }
 0x32b   :  { %v3146_v59 = vpack.c.bf16 %v537_v55, %v534_v54  ;;  %v346_v60 = vpop.f32.mrb[6].mxu0 }
 0x32c   :  { %v2382_v61 = vpop.f32.mrb[7].mxu0 }
 0x32d   :  { %2404 = vmatpush3.bf16.msra.mxu1 %v3146_v59 }
 0x32e   :  { %2415 = vmatprep.subr.bf16.mxu1 %v2898_v0 }
 0x331   :  { %v490_v2 = vpop.f32.mrb[8].mxu0 }
 0x332   :  { %v492_v4 = vpop.f32.mrb[9].mxu0  ;;  %v491_v6 = vadd.f32 %v490_v2, %v409_v1 }
 0x333   :  { %v494_v5 = vpop.f32.mrb[10].mxu0  ;;  %v493_v9 = vadd.f32 %v492_v4, %v413_v3 }
 0x334   :  { %v495_v7 = vadd.f32 %v494_v5, %v409_v1  ;;  %v496_v8 = vpop.f32.mrb[11].mxu0 }
 0x335   :  { %v497_v10 = vadd.f32 %v496_v8, %v413_v3 }
 0x336   :  { %v540_v11 = vpack.c.bf16 %v495_v7, %v491_v6 }
 0x337   :  { %v541_v12 = vpack.c.bf16 %v497_v10, %v493_v9 }
 0x339   :  { %801 = vrot.lane.b32.xlu1 %v541_v12, %s2891_s7  ;;  %673 = vrot.lane.b32.xlu0 %v541_v12, %s2901_s0  ;;  %v546_v15 = vsel %vm238_vm3, %v541_v12, 0 }
 0x33a   :  { %2398 = vmatpush3.bf16.xpose.msra.mxu0 %v546_v15 }
 0x33b   :  { %2409 = vmatprep.subr.bf16.mxu0 %v2898_v0 }
 0x33d   :  { %799 = vrot.lane.b32.xlu1 %v540_v11, %s2891_s7  ;;  %670 = vrot.lane.b32.xlu0 %v540_v11, %s2901_s0 }
 0x341   :  { %926 = vrot.lane.b32.xlu1 %v540_v11, %s2902_s17  ;;  %928 = vrot.lane.b32.xlu0 %v541_v12, %s2902_s17 }
 0x342   :  { %2400 = vmatmul.mubr.msk.bf16.vlgmr.msra.gmra.mrb[12].mxu0 %vm238_vm3, %v540_v11 }
 0x343   :  { %2411 = vmatprep.mubr.msk.bf16.mxu0 %vm2899_vm0, %v2898_v0 }
 0x3ab   :  { %v674_v16 = vpop.permute.xlu0 %673  ;;  %v802_v18 = vpop.permute.xlu1 %801 }
 0x3ac   :  { %v679_v17 = vsel %vm238_vm3, %v674_v16, 0  ;;  %v807_v21 = vsel %vm238_vm3, %v802_v18, 0 }
 0x3ad   :  { %2410 = vmatpush3.bf16.xpose.msra.mxu0 %v679_v17 }
 0x3ae   :  { %2421 = vmatprep.subr.bf16.mxu0 %v2898_v0 }
 0x3af   :  { %v671_v19 = vpop.permute.xlu0 %670  ;;  %v800_v23 = vpop.permute.xlu1 %799 }
 0x3b3   :  { %v929_v22 = vpop.permute.xlu0 %928  ;;  %v927_v25 = vpop.permute.xlu1 %926 }
 0x3b4   :  { %2412 = vmatmul.mubr.msk.bf16.vlgmr.msra.gmra.mrb[16].mxu0 %vm238_vm3, %v671_v19  ;;  %v934_v24 = vsel %vm238_vm3, %v929_v22, 0 }
 0x3b5   :  { %2422 = vmatpush3.bf16.xpose.msra.mxu0 %v807_v21  ;;  %2423 = vmatprep.mubr.msk.bf16.mxu0 %vm2899_vm0, %v2898_v0 }
 0x3b6   :  { %2433 = vmatprep.subr.bf16.mxu0 %v2898_v0 }
 0x3bc   :  { %2424 = vmatmul.mubr.msk.bf16.vlgmr.msra.gmra.mrb[20].mxu0 %vm238_vm3, %v800_v23 }
 0x3bd   :  { %2434 = vmatpush3.bf16.xpose.msra.mxu0 %v934_v24  ;;  %2435 = vmatprep.mubr.msk.bf16.mxu0 %vm2899_vm0, %v2898_v0 }
 0x3be   :  { %2445 = vmatprep.subr.bf16.mxu0 %v2898_v0 }
 0x3c4   :  { %2436 = vmatmul.mubr.msk.bf16.vlgmr.msra.gmra.mrb[24].mxu0 %vm238_vm3, %v927_v25 }
 0x3c5   :  { %2447 = vmatprep.mubr.msk.bf16.mxu0 %vm2899_vm0, %v2898_v0 }
 0x415   :  { %v582_v32 = vpop.f32.mrb[12].mxu0 }
 0x416   :  { %v595_v13 = vsel %vm3186_vm13, %v582_v32, -1e+30  ;;  %v2401_v34 = vpop.f32.mrb[13].mxu0 }
 0x417   :  { %v585_v14 = vpop.f32.mrb[14].mxu0  ;;  %v597_v35 = vsel %vm305_vm10, %v595_v13, -inf }
 0x418   :  { %v596_v36 = vsel %vm3190_vm14, %v585_v14, -1e+30  ;;  %v2402_v37 = vpop.f32.mrb[15].mxu0  ;;  %598 = vmax.xlane.f32.xlu0 %v597_v35 }
 0x419   :  { %v600_v38 = vsel %vm305_vm10, %v596_v36, -inf }
 0x41a   :  { %601 = vmax.xlane.f32.xlu1 %v600_v38 }
 0x42b   :  { %750 = vrot.lane.b32.xlu1 %v3146_v59, %s2901_s0 }
 0x487   :  { %v715_v39 = vpop.f32.mrb[16].mxu0 }
 0x488   :  { %v722_v40 = vsel %vm3186_vm13, %v715_v39, -1e+30  ;;  %v2413_v41 = vpop.f32.mrb[17].mxu0 }
 0x489   :  { %v718_v42 = vpop.f32.mrb[18].mxu0  ;;  %v724_v45 = vsel %vm305_vm10, %v722_v40, -inf }
 0x48a   :  { %v723_v46 = vsel %vm3190_vm14, %v718_v42, -1e+30  ;;  %v2414_v47 = vpop.f32.mrb[19].mxu0  ;;  %725 = vmax.xlane.f32.xlu0 %v724_v45 }
 0x48b   :  { %v727_v48 = vsel %vm305_vm10, %v723_v46, -inf }
 0x48e   :  { %728 = vmax.xlane.f32.xlu0 %v727_v48 }
 0x48f   :  { %v843_v49 = vpop.f32.mrb[20].mxu0 }
 0x490   :  { %v850_v50 = vsel %vm3186_vm13, %v843_v49, -1e+30  ;;  %v2425_v51 = vpop.f32.mrb[21].mxu0 }
 0x491   :  { %v846_v52 = vpop.f32.mrb[22].mxu0  ;;  %v852_v53 = vsel %vm305_vm10, %v850_v50, -inf }
 0x492   :  { %v851_v54 = vsel %vm3190_vm14, %v846_v52, -1e+30  ;;  %v2426_v55 = vpop.f32.mrb[23].mxu0  ;;  %853 = vmax.xlane.f32.xlu1 %v852_v53 }
 0x493   :  { %v855_v57 = vsel %vm305_vm10, %v851_v54, -inf }
 0x494   :  { %856 = vmax.xlane.f32.xlu0 %v855_v57 }
 0x497   :  { %v970_v58 = vpop.f32.mrb[24].mxu0 }
 0x498   :  { %v977_v60 = vsel %vm3186_vm13, %v970_v58, -1e+30  ;;  %v2437_v61 = vpop.f32.mrb[25].mxu0  ;;  %vm395_vm13 = vcmp.gt.f32.partialorder %v3141_v44, 0.0 }
 0x499   :  { %v973_v1 = vpop.f32.mrb[26].mxu0  ;;  %v979_v2 = vsel %vm305_vm10, %v977_v60, -inf }
 0x49a   :  { %v978_v3 = vsel %vm3190_vm14, %v973_v1, -1e+30  ;;  %v2438_v4 = vpop.f32.mrb[27].mxu0  ;;  %980 = vmax.xlane.f32.xlu1 %v979_v2 }
 0x49b   :  { %v982_v5 = vsel %vm305_vm10, %v978_v3, -inf }
 0x49c   :  { %983 = vmax.xlane.f32.xlu0 %v982_v5 }
 0x4a5   :  { %v3220_v6 = vpop.xlane.xlu0 %598 }
 0x4a6   :  { %v603_v7 = vsub.f32 %v595_v13, %v3220_v6  ;;  %vm615_vm8 = vcmp.gt.f32.partialorder %v3220_v6, -1e+29 }
 0x4a7   :  { %v3223_v8 = vpop.xlane.xlu1 %601 }
 0x4a8   :  { %v605_v9 = vmul.f32 1.442695, %v603_v7  ;;  %v604_v10 = vsub.f32 %v596_v36, %v3223_v8  ;;  %vm616_vm15 = vcmp.gt.f32.partialorder %v3223_v8, -1e+29 }
 0x4aa   :  { %v607_v11 = vmul.f32 1.442695, %v604_v10  ;;  %2638 = vpow2.f32 %v605_v9 }
 0x4ab   :  { %1004 = vrot.lane.b32.xlu1 %v3146_v59, %s2902_s17  ;;  %v751_v17 = vpop.permute.xlu1 %750 }
 0x4ac   :  { %2640 = vpow2.f32 %v607_v11 }
 0x4b2   :  { %877 = vrot.lane.b32.xlu0 %v3146_v59, %s2891_s7 }
 0x4b4   :  { %v2639_v12 = vpop.eup %2638 }
 0x4b5   :  { %v609_v53 = vsel %vm305_vm10, %v2639_v12, 0.0 }
 0x4b6   :  { %v3230_v15 = vpop.eup %2640 }
 0x4b7   :  { %v621_v16 = vpack.c.bf16 %v3230_v15, %v2639_v12  ;;  %v612_v55 = vsel %vm305_vm10, %v3230_v15, 0.0 }
 0x4b9   :  { %2406 = vmatmul.mubr.msk.bf16.vlgmr.msra.gmra.mrb[12].mxu1 %vm305_vm10, %v621_v16 }
 0x4ba   :  { %2416 = vmatpush3.bf16.msra.mxu1 %v751_v17  ;;  %2417 = vmatprep.mubr.msk.bf16.mxu1 %vm2899_vm0, %v2898_v0 }
 0x4bb   :  { %2427 = vmatprep.subr.bf16.mxu1 %v2898_v0 }
 0x517   :  { %v3237_v18 = vpop.xlane.xlu0 %725 }
 0x518   :  { %v730_v19 = vsub.f32 %v722_v40, %v3237_v18  ;;  %vm742_vm1 = vcmp.gt.f32.partialorder %v3237_v18, -1e+29 }
 0x51a   :  { %v732_v21 = vmul.f32 1.442695, %v730_v19 }
 0x51b   :  { %v3240_v59 = vpop.xlane.xlu0 %728 }
 0x51c   :  { %2642 = vpow2.f32 %v732_v21  ;;  %v731_v22 = vsub.f32 %v723_v46, %v3240_v59  ;;  %vm743_vm2 = vcmp.gt.f32.partialorder %v3240_v59, -1e+29 }
 0x51e   :  { %v734_v23 = vmul.f32 1.442695, %v731_v22 }
 0x51f   :  { %v3243_v24 = vpop.xlane.xlu1 %853 }
 0x520   :  { %2644 = vpow2.f32 %v734_v23  ;;  %v858_v25 = vsub.f32 %v850_v50, %v3243_v24  ;;  %vm870_vm4 = vcmp.gt.f32.partialorder %v3243_v24, -1e+29 }
 0x521   :  { %v3246_v27 = vpop.xlane.xlu0 %856 }
 0x522   :  { %v860_v28 = vmul.f32 1.442695, %v858_v25  ;;  %v859_v29 = vsub.f32 %v851_v54, %v3246_v27  ;;  %vm871_vm5 = vcmp.gt.f32.partialorder %v3246_v27, -1e+29 }
 0x524   :  { %2646 = vpow2.f32 %v860_v28  ;;  %v862_v30 = vmul.f32 1.442695, %v859_v29 }
 0x526   :  { %v2643_v31 = vpop.eup %2642  ;;  %2648 = vpow2.f32 %v862_v30 }
 0x527   :  { %v3249_v32 = vpop.xlane.xlu1 %980  ;;  %v736_v33 = vsel %vm305_vm10, %v2643_v31, 0.0 }
 0x528   :  { %v985_v13 = vsub.f32 %v977_v60, %v3249_v32  ;;  %737 = vadd.xlane.f32.xlu1 %v736_v33  ;;  %vm997_vm6 = vcmp.gt.f32.partialorder %v3249_v32, -1e+29  ;;  %v2609_v32 = vld [vmem:[%s3587_s8 + $0x8] sm:$0xff]  }
 0x529   :  { %v3253_v34 = vpop.xlane.xlu0 %983 }
 0x52a   :  { %v2645_v14 = vpop.eup %2644  ;;  %v987_v35 = vmul.f32 1.442695, %v985_v13  ;;  %v986_v36 = vsub.f32 %v978_v3, %v3253_v34  ;;  %vm998_vm7 = vcmp.gt.f32.partialorder %v3253_v34, -1e+29  ;;  %v2610_v34 = vld [vmem:[%s3587_s8 + $0x10] sm:$0xff]  }
 0x52b   :  { %v739_v37 = vsel %vm305_vm10, %v2645_v14, 0.0  ;;  %v748_v38 = vpack.c.bf16 %v2645_v14, %v2643_v31  ;;  %v1005_v48 = vpop.permute.xlu1 %1004 }
 0x52c   :  { %2650 = vpow2.f32 %v987_v35  ;;  %v989_v39 = vmul.f32 1.442695, %v986_v36  ;;  %740 = vadd.xlane.f32.xlu0 %v739_v37 }
 0x52d   :  { %2418 = vmatmul.mubr.msk.bf16.vlgmr.msra.gmra.mrb[16].mxu1 %vm305_vm10, %v748_v38  ;;  %v878_v40 = vpop.permute.xlu0 %877 }
 0x52e   :  { %v2647_v41 = vpop.eup %2646  ;;  %2652 = vpow2.f32 %v989_v39  ;;  %2428 = vmatpush3.bf16.msra.mxu1 %v878_v40  ;;  %2429 = vmatprep.mubr.msk.bf16.mxu1 %vm2899_vm0, %v2898_v0 }
 0x52f   :  { %v864_v42 = vsel %vm305_vm10, %v2647_v41, 0.0  ;;  %2439 = vmatprep.subr.bf16.mxu1 %v2898_v0 }
 0x530   :  { %v2649_v45 = vpop.eup %2648  ;;  %865 = vadd.xlane.f32.xlu0 %v864_v42 }
 0x531   :  { %v867_v46 = vsel %vm305_vm10, %v2649_v45, 0.0  ;;  %v876_v47 = vpack.c.bf16 %v2649_v45, %v2647_v41 }
 0x532   :  { %868 = vadd.xlane.f32.xlu1 %v867_v46 }
 0x535   :  { %2430 = vmatmul.mubr.msk.bf16.vlgmr.msra.gmra.mrb[20].mxu1 %vm305_vm10, %v876_v47 }
 0x536   :  { %v2651_v49 = vpop.eup %2650  ;;  %2440 = vmatpush3.bf16.msra.mxu1 %v1005_v48  ;;  %2441 = vmatprep.mubr.msk.bf16.mxu1 %vm2899_vm0, %v2898_v0 }
 0x537   :  { %v991_v50 = vsel %vm305_vm10, %v2651_v49, 0.0  ;;  %2451 = vmatprep.subr.bf16.mxu1 %v2898_v0 }
 0x538   :  { %v2653_v51 = vpop.eup %2652  ;;  %992 = vadd.xlane.f32.xlu0 %v991_v50  ;;  %v2608_v50 = vld [vmem:[%s3587_s8] sm:$0xff]  }
 0x539   :  { %v994_v52 = vsel %vm305_vm10, %v2653_v51, 0.0  ;;  %v1003_v54 = vpack.c.bf16 %v2653_v51, %v2651_v49  ;;  %v2611_v51 = vld [vmem:[%s3587_s8 + $0x18] sm:$0xff]  }
 0x53a   :  { %995 = vadd.xlane.f32.xlu1 %v994_v52  ;;  %v2612_v52 = vld [vmem:[%s3587_s8 + $0x20] sm:$0xff]  }
 0x53c   :  { %610 = vadd.xlane.f32.xlu0 %v609_v53  ;;  %v2613_v53 = vld [vmem:[%s3587_s8 + $0x28] sm:$0xff]  }
 0x53d   :  { %2442 = vmatmul.mubr.msk.bf16.vlgmr.msra.gmra.mrb[24].mxu1 %vm305_vm10, %v1003_v54  ;;  %v2614_v54 = vld [vmem:[%s3587_s8 + $0x30] sm:$0xff]  }
 0x53e   :  { %613 = vadd.xlane.f32.xlu1 %v612_v55  ;;  %2467 = vmatprep.mubr.msk.bf16.mxu1 %vm2899_vm0, %v2898_v0 }
 0x53f   :  { %2452 = vmatpush3.bf16.msra.mxu1 %v2608_v50 }
 0x540   :  { %2453 = vmatprep.subr.bf16.mxu1 %v2898_v0 }
 0x543   :  { %2454 = vmatpush3.bf16.msra.mxu1 %v2609_v32 }
 0x544   :  { %2455 = vmatprep.subr.bf16.mxu1 %v2898_v0 }
 0x547   :  { %2456 = vmatpush3.bf16.msra.mxu1 %v2610_v34 }
 0x548   :  { %2457 = vmatprep.subr.bf16.mxu1 %v2898_v0 }
 0x54b   :  { %2458 = vmatpush3.bf16.msra.mxu1 %v2611_v51 }
 0x54c   :  { %2459 = vmatprep.subr.bf16.mxu1 %v2898_v0 }
 0x54f   :  { %2460 = vmatpush3.bf16.msra.mxu1 %v2612_v52 }
 0x550   :  { %2461 = vmatprep.subr.bf16.mxu1 %v2898_v0 }
 0x553   :  { %2462 = vmatpush3.bf16.msra.mxu1 %v2613_v53 }
 0x554   :  { %2463 = vmatprep.subr.bf16.mxu1 %v2898_v0 }
 0x557   :  { %2464 = vmatpush3.bf16.msra.mxu1 %v2614_v54 }
 0x558   :  { %2465 = vmatprep.subr.bf16.mxu1 %v2898_v0 }
 0x58c   :  { %v3275_v57 = vpop.f32.mrb[12].mxu1 }
 0x58d   :  { %v2407_v58 = vpop.f32.mrb[13].mxu1 }
 0x58e   :  { %v663_v60 = vpop.f32.mrb[14].mxu1 }
 0x58f   :  { %v2408_v61 = vpop.f32.mrb[15].mxu1 }
 0x5b5   :  { %v738_v1 = vpop.xlane.xlu1 %737 }
 0x5b9   :  { %v741_v10 = vpop.xlane.xlu0 %740 }
 0x5bd   :  { %v866_v11 = vpop.xlane.xlu0 %865 }
 0x5bf   :  { %v869_v2 = vpop.xlane.xlu1 %868 }
 0x5c5   :  { %v993_v16 = vpop.xlane.xlu0 %992 }
 0x5c7   :  { %v996_v3 = vpop.xlane.xlu1 %995 }
 0x5c9   :  { %v611_v55 = vpop.xlane.xlu0 %610 }
 0x5cb   :  { %v614_v4 = vpop.xlane.xlu1 %613 }
 0x5cc   :  { %2654 = vrcp.f32 %v614_v4 }
 0x5cd   :  { %2656 = vrcp.f32 %v738_v1 }
 0x5ce   :  { %2658 = vrcp.f32 %v741_v10 }
 0x5cf   :  { %2660 = vrcp.f32 %v866_v11 }
 0x5d0   :  { %2662 = vrcp.f32 %v869_v2 }
 0x5d1   :  { %2664 = vrcp.f32 %v993_v16 }
 0x5d2   :  { %2666 = vrcp.f32 %v996_v3 }
 0x5d3   :  { %2668 = vrcp.f32 %v611_v55 }
 0x5d6   :  { %v2655_v5 = vpop.eup %2654 }
 0x5d7   :  { %v620_v7 = vsel %vm616_vm15, %v2655_v5, 0.0  ;;  %v2657_v12 = vpop.eup %2656 }
 0x5d8   :  { %v3278_v9 = vmul.f32 %v663_v60, %v620_v7  ;;  %v2659_v15 = vpop.eup %2658  ;;  %v746_v17 = vsel %vm742_vm1, %v2657_v12, 0.0 }
 0x5d9   :  { %v747_v22 = vsel %vm743_vm2, %v2659_v15, 0.0  ;;  %v2661_v29 = vpop.eup %2660 }
 0x5da   :  { %v2663_v31 = vpop.eup %2662  ;;  %v874_v18 = vsel %vm870_vm4, %v2661_v29, 0.0  ;;  %v2592_v29 = vld [vmem:[%s3604_s26 + $0x24] ss:$8 sps:$4 sm:$0xff]  }
 0x5db   :  { %v875_v14 = vsel %vm871_vm5, %v2663_v31, 0.0  ;;  %v2665_v38 = vpop.eup %2664  ;;  %v2598_v31 = vld [vmem:[%s3604_s26 + $0x44] ss:$8 sps:$4 sm:$0xff]  }
 0x5dc   :  { %v2667_v40 = vpop.eup %2666  ;;  %v1001_v24 = vsel %vm997_vm6, %v2665_v38, 0.0 }
 0x5dd   :  { %v1002_v27 = vsel %vm998_vm7, %v2667_v40, 0.0  ;;  %v2669_v58 = vpop.eup %2668 }
 0x5de   :  { %v619_v1 = vsel %vm615_vm8, %v2669_v58, 0.0 }
 0x5df   :  { %v667_v7 = vmul.f32 %v3275_v57, %v619_v1 }
 0x600   :  { %v790_v19 = vpop.f32.mrb[16].mxu1 }
 0x601   :  { %v797_v21 = vmul.f32 %v790_v19, %v746_v17  ;;  %v2419_v8 = vpop.f32.mrb[17].mxu1 }
 0x602   :  { %v793_v23 = vpop.f32.mrb[18].mxu1 }
 0x603   :  { %v798_v25 = vmul.f32 %v793_v23, %v747_v22  ;;  %v2420_v28 = vpop.f32.mrb[19].mxu1  ;;  %v2586_v22 = vld [vmem:[%s3604_s26 + $0x4] ss:$8 sps:$4 sm:$0xff]  }
 0x604   :  { %v2587_v28 = vld [vmem:[%s3604_s26 + $0x10] ss:$8 sps:$4 sm:$0xff]  }
 0x605   :  { %v2557_v30 = vpack.i.bf16 %v798_v25, %v797_v21  ;;  %v2589_v25 = vld [vmem:[%s3604_s26 + $0x14] ss:$8 sps:$4 sm:$0xff]  }
 0x607   :  { %2558 = vrot.lane.b32.xlu0 %v2557_v30, %s2902_s17  ;;  %v2590_v30 = vld [vmem:[%s3604_s26 + $0x20] ss:$8 sps:$4 sm:$0xff]  }
 0x608   :  { %v917_v33 = vpop.f32.mrb[20].mxu1 }
 0x609   :  { %v924_v59 = vmul.f32 %v917_v33, %v874_v18  ;;  %v2431_v13 = vpop.f32.mrb[21].mxu1  ;;  %v2596_v18 = vld [vmem:[%s3604_s26 + $0x40] ss:$8 sps:$4 sm:$0xff]   ;;  %v2601_v33 = vld [vmem:[%s3604_s26 + $0x54] ss:$8 sps:$4 sm:$0xff]  }
 0x60a   :  { %v920_v35 = vpop.f32.mrb[22].mxu1  ;;  %v2604_v13 = vld [vmem:[%s3604_s26 + $0x64] ss:$8 sps:$4 sm:$0xff]  }
 0x60b   :  { %v925_v36 = vmul.f32 %v920_v35, %v875_v14  ;;  %v2432_v37 = vpop.f32.mrb[23].mxu1  ;;  %v2602_v14 = vld [vmem:[%s3604_s26 + $0x60] ss:$8 sps:$4 sm:$0xff]   ;;  %v2607_v35 = vld [vmem:[%s3604_s26 + $0x74] ss:$8 sps:$4 sm:$0xff]  }
 0x60c   :  { %v2615_v37 = vld [vmem:[%s3587_s8 + $0x38] sm:$0xff]  }
 0x60d   :  { %v2562_v39 = vpack.i.bf16 %v925_v36, %v924_v59  ;;  %v2599_v59 = vld [vmem:[%s3604_s26 + $0x50] ss:$8 sps:$4 sm:$0xff]   ;;  %2466 = vmatpush3.bf16.msra.mxu1 %v2615_v37 }
 0x60e   :  { %v2605_v36 = vld [vmem:[%s3604_s26 + $0x70] ss:$8 sps:$4 sm:$0xff]   ;;  %2471 = vmatprep.subr.bf16.mxu1 %v2898_v0 }
 0x60f   :  { %2563 = vrot.lane.b32.xlu1 %v2562_v39, %s2891_s7 }
 0x610   :  { %v1044_v41 = vpop.f32.mrb[24].mxu1 }
 0x611   :  { %v1051_v42 = vmul.f32 %v1044_v41, %v1001_v24  ;;  %v2443_v45 = vpop.f32.mrb[25].mxu1 }
 0x612   :  { %v1047_v46 = vpop.f32.mrb[26].mxu1 }
 0x613   :  { %v1052_v47 = vmul.f32 %v1047_v46, %v1002_v27  ;;  %v2444_v48 = vpop.f32.mrb[27].mxu1 }
 0x615   :  { %v2567_v49 = vpack.i.bf16 %v1052_v47, %v1051_v42  ;;  %v1256_v42 = vld [vmem:[#allocation15 + $0x1] sm:$0x3] }
 0x616   :  { %v1261_v45 = vrot.slane %v1256_v42, %v408_v62  ;;  %v1265_v46 = vrot.slane %v1256_v42, %v412_v63 }
 0x617   :  { %2568 = vrot.lane.b32.xlu1 %v2567_v49, %s2901_s0 }
 0x679   :  { %v2559_v60 = vpop.permute.xlu0 %2558 }
 0x67a   :  { %v2561_v2 = vunpack.i.h.bf16 %v2559_v60  ;;  %v2560_v3 = vunpack.i.l.bf16 %v2559_v60 }
 0x67c   :  { %v1078_v11 = vsel %vm238_vm3, %v3278_v9, %v2561_v2  ;;  %v1077_v12 = vsel %vm238_vm3, %v667_v7, %v2560_v3  ;;  %v2584_v9 = vld [vmem:[%s3604_s26] ss:$8 sps:$4 sm:$0xff]  }
 0x681   :  { %v2564_v61 = vpop.permute.xlu1 %2563 }
 0x682   :  { %v2566_v4 = vunpack.i.h.bf16 %v2564_v61  ;;  %v2565_v5 = vunpack.i.l.bf16 %v2564_v61 }
 0x684   :  { %v1080_v6 = vsel %vm1079_vm9, %v1077_v12, %v2565_v5  ;;  %v1081_v17 = vsel %vm1079_vm9, %v1078_v11, %v2566_v4 }
 0x689   :  { %v2569_v10 = vpop.permute.xlu1 %2568 }
 0x68a   :  { %v2571_v15 = vunpack.i.h.bf16 %v2569_v10  ;;  %v2570_v16 = vunpack.i.l.bf16 %v2569_v10 }
 0x68c   :  { %v1083_v19 = vsel %vm1082_vm11, %v1080_v6, %v2570_v16  ;;  %v1084_v21 = vsel %vm1082_vm11, %v1081_v17, %v2571_v15 }
 0x68d   :  { %v1085_v8 = vmax.f32 %v1083_v19, 0.0  ;;  %v1086_v57 = vmax.f32 %v1084_v21, 0.0 }
 0x68f   :  { %v1087_v23 = vpack.c.bf16 %v1086_v57, %v1085_v8 }
 0x691   :  { %2446 = vmatpush3.bf16.msra.mxu0 %v1087_v23 }
 0x692   :  { %1348 = vmatprep.subr.bf16.mxu0 %v2586_v22 }
 0x694   :  { %2448 = vmatmul.mubr.msk.bf16.vlgmr.msra.gmra.mrb[28].mxu0 %vm305_vm10, %v3123_v26  ;;  %v2595_v26 = vld [vmem:[%s3604_s26 + $0x34] ss:$8 sps:$4 sm:$0xff]  }
 0x695   :  { %1349 = vmatpush1.bf16.msra.mxu0 %v2584_v9  ;;  %1380 = vmatprep.mubr.bf16.mxu0 %v2900_v43  ;;  %v2593_v43 = vld [vmem:[%s3604_s26 + $0x30] ss:$8 sps:$4 sm:$0xff]  }
 0x696   :  { %1350 = vmatprep.subr.bf16.mxu0 %v2589_v25 }
 0x699   :  { %1351 = vmatpush1.bf16.msra.mxu0 %v2587_v28 }
 0x69a   :  { %1352 = vmatprep.subr.bf16.mxu0 %v2592_v29 }
 0x69d   :  { %1353 = vmatpush1.bf16.msra.mxu0 %v2590_v30 }
 0x69e   :  { %1354 = vmatprep.subr.bf16.mxu0 %v2595_v26 }
 0x6a1   :  { %1355 = vmatpush1.bf16.msra.mxu0 %v2593_v43 }
 0x6a2   :  { %1356 = vmatprep.subr.bf16.mxu0 %v2598_v31 }
 0x6a5   :  { %1357 = vmatpush1.bf16.msra.mxu0 %v2596_v18 }
 0x6a6   :  { %1358 = vmatprep.subr.bf16.mxu0 %v2601_v33 }
 0x6a9   :  { %1359 = vmatpush1.bf16.msra.mxu0 %v2599_v59 }
 0x6aa   :  { %1360 = vmatprep.subr.bf16.mxu0 %v2604_v13 }
 0x6ad   :  { %1361 = vmatpush1.bf16.msra.mxu0 %v2602_v14 }
 0x6ae   :  { %1362 = vmatprep.subr.bf16.mxu0 %v2607_v35 }
 0x6b1   :  { %1363 = vmatpush1.bf16.msra.mxu0 %v2605_v36 }
 0x6b2   :  { %2477 = vmatprep.subr.bf16.mxu0 %v2898_v0 }
 0x6b4   :  { %1381 = vmatmul.mubr.bf16.vlgmr.msra.gmra.mrb[32].mxu0 %v1087_v23 }
 0x6b5   :  { %2479 = vmatprep.mubr.msk.bf16.mxu0 %vm2899_vm0, %v2898_v0 }
 0x767   :  { %v1122_v38 = vpop.f32.mrb[28].mxu0 }
 0x768   :  { %v3384_v39 = vpack.c.bf16 %v1122_v38, %v1122_v38  ;;  %v2449_v40 = vpop.f32.mrb[29].mxu0 }
 0x769   :  { %v1125_v24 = vpop.f32.mrb[30].mxu0 }
 0x76a   :  { %v2450_v41 = vpop.f32.mrb[31].mxu0  ;;  %2468 = vmatmul.mubr.bf16.vlgmr.msra.gmra.mrb[28].mxu1 %v3384_v39 }
 0x76b   :  { %2473 = vmatprep.mubr.msk.bf16.mxu1 %vm2899_vm0, %v2898_v0 }
 0x787   :  { %v1382_v27 = vpop.f32.mrb[32].mxu0 }
 0x788   :  { %v1384_v47 = vpop.f32.mrb[33].mxu0  ;;  %v1383_v49 = vadd.f32 %v1382_v27, %v1261_v45 }
 0x789   :  { %v1386_v48 = vpop.f32.mrb[34].mxu0  ;;  %v1385_v34 = vadd.f32 %v1384_v47, %v1265_v46 }
 0x78a   :  { %v1387_v50 = vadd.f32 %v1386_v48, %v1261_v45  ;;  %v1388_v32 = vpop.f32.mrb[35].mxu0 }
 0x78b   :  { %v1389_v51 = vadd.f32 %v1388_v32, %v1265_v46 }
 0x78c   :  { %v1392_v52 = vpack.c.bf16 %v1387_v50, %v1383_v49 }
 0x78d   :  { %v3393_v53 = vpack.c.bf16 %v1389_v51, %v1385_v34 }
 0x78e   :  { %1503 = vrot.lane.b32.xlu0 %v1392_v52, %s2901_s0  ;;  %v1397_v54 = vsel %vm238_vm3, %v1392_v52, 0 }
 0x78f   :  { %2472 = vmatpush3.bf16.xpose.msra.mxu1 %v1397_v54  ;;  %2478 = vmatpush3.bf16.msra.mxu0 %v3393_v53 }
 0x790   :  { %2483 = vmatprep.subr.bf16.mxu1 %v2898_v0  ;;  %2489 = vmatprep.subr.bf16.mxu0 %v2898_v0 }
 0x792   :  { %1615 = vrot.lane.b32.xlu0 %v1392_v52, %s2891_s7 }
 0x796   :  { %1726 = vrot.lane.b32.xlu0 %v1392_v52, %s2902_s17 }
 0x800   :  { %v1504_v58 = vpop.permute.xlu0 %1503 }
 0x801   :  { %v1509_v2 = vsel %vm238_vm3, %v1504_v58, 0  ;;  %v2616_v58 = vld [vmem:[%s3590_s11] sm:$0xff]  }
 0x804   :  { %v1616_v3 = vpop.permute.xlu0 %1615 }
 0x805   :  { %v1621_v5 = vsel %vm238_vm3, %v1616_v3, 0 }
 0x808   :  { %v1727_v7 = vpop.permute.xlu0 %1726 }
 0x809   :  { %v1732_v11 = vsel %vm238_vm3, %v1727_v7, 0 }
 0x83d   :  { %v1234_v62 = vpop.f32.mrb[28].mxu1 }
 0x83e   :  { %v1235_v63 = vadd.f32 %v2219_v20, %v1234_v62  ;;  %v2469_v55 = vpop.f32.mrb[29].mxu1 }
 0x83f   :  { %v1237_v60 = vpop.f32.mrb[30].mxu1 }
 0x840   :  { %v1391_v61 = vpack.c.bf16 %v1235_v63, %v1235_v63  ;;  %v2470_v1 = vpop.f32.mrb[31].mxu1 }
 0x841   :  { %v2617_v1 = vld [vmem:[%s3590_s11 + $0x8] sm:$0xff]  }
 0x842   :  { %1500 = vrot.lane.b32.xlu1 %v1391_v61, %s2901_s0  ;;  %2474 = vmatmul.mubr.msk.bf16.vlgmr.msra.gmra.mrb[32].mxu1 %vm238_vm3, %v1391_v61 }
 0x843   :  { %2484 = vmatpush3.bf16.xpose.msra.mxu1 %v1509_v2  ;;  %2485 = vmatprep.mubr.msk.bf16.mxu1 %vm2899_vm0, %v2898_v0  ;;  %v1855_v2 = vpack.c.bf16 %v3144_v56, %v3144_v56  ;;  %v2619_v56 = vld [vmem:[%s3591_s12] sm:$0xff]  }
 0x844   :  { %2495 = vmatprep.subr.bf16.mxu1 %v2898_v0 }
 0x846   :  { %1613 = vrot.lane.b32.xlu1 %v1391_v61, %s2891_s7 }
 0x84a   :  { %1724 = vrot.lane.b32.xlu1 %v1391_v61, %s2902_s17 }
 0x8b4   :  { %v1501_v4 = vpop.permute.xlu1 %1500 }
 0x8b5   :  { %2486 = vmatmul.mubr.msk.bf16.vlgmr.msra.gmra.mrb[36].mxu1 %vm238_vm3, %v1501_v4 }
 0x8b6   :  { %2496 = vmatpush3.bf16.xpose.msra.mxu1 %v1621_v5  ;;  %2497 = vmatprep.mubr.msk.bf16.mxu1 %vm2899_vm0, %v2898_v0 }
 0x8b7   :  { %2507 = vmatprep.subr.bf16.mxu1 %v2898_v0 }
 0x8b8   :  { %v1614_v10 = vpop.permute.xlu1 %1613 }
 0x8bc   :  { %v1725_v12 = vpop.permute.xlu1 %1724 }
 0x8bd   :  { %2498 = vmatmul.mubr.msk.bf16.vlgmr.msra.gmra.mrb[40].mxu1 %vm238_vm3, %v1614_v10  ;;  %v2618_v10 = vld [vmem:[%s3591_s12 + $0x40] sm:$0xff]  }
 0x8be   :  { %2508 = vmatpush3.bf16.xpose.msra.mxu1 %v1732_v11  ;;  %2509 = vmatprep.mubr.msk.bf16.mxu1 %vm2899_vm0, %v2898_v0  ;;  %v2620_v11 = vld [vmem:[%s3591_s12 + $0x48] sm:$0xff]  }
 0x8bf   :  { %2333 = vmatprep.subr.bf16.mxu1 %v2618_v10 }
 0x8c5   :  { %2510 = vmatmul.mubr.msk.bf16.vlgmr.msra.gmra.mrb[44].mxu1 %vm238_vm3, %v1725_v12  ;;  %v2621_v12 = vld [vmem:[%s3591_s12 + $0x8] sm:$0xff]  }
 0x8c6   :  { %2334 = vmatpush3.bf16.msra.mxu1 %v2619_v56  ;;  %v2271_v56 = vld [vmem:[%s3592_s13] ss:$0 sm:$0xff] }
 0x8c7   :  { %2335 = vmatprep.subr.bf16.mxu1 %v2620_v11 }
 0x8ca   :  { %2336 = vmatpush3.bf16.msra.mxu1 %v2621_v12 }
 0x915   :  { %v1433_v15 = vpop.f32.mrb[32].mxu1 }
 0x916   :  { %v1439_v16 = vsel %vm395_vm13, %v1433_v15, -1e+30  ;;  %v2475_v6 = vpop.f32.mrb[33].mxu1  ;;  %v2622_v15 = vld [vmem:[%s3591_s12 + $0x50] sm:$0xff]  }
 0x917   :  { %v1436_v17 = vpop.f32.mrb[34].mxu1  ;;  %v1441_v19 = vsel %vm1440_vm12, %v1439_v16, -inf  ;;  %2337 = vmatprep.subr.bf16.mxu1 %v2622_v15 }
 0x918   :  { %1442 = vmax.xlane.f32.xlu0 %v1441_v19  ;;  %v2476_v21 = vpop.f32.mrb[35].mxu1  ;;  %v2624_v17 = vld [vmem:[%s3591_s12 + $0x58] sm:$0xff]  }
 0x919   :  { %v2625_v19 = vld [vmem:[%s3591_s12 + $0x18] sm:$0xff]   ;;  %v2626_v21 = vld [vmem:[%s3591_s12 + $0x60] sm:$0xff]  }
 0x988   :  { %v1545_v8 = vpop.f32.mrb[36].mxu1 }
 0x989   :  { %v1551_v57 = vsel %vm395_vm13, %v1545_v8, -1e+30  ;;  %v2487_v22 = vpop.f32.mrb[37].mxu1 }
 0x98a   :  { %v1548_v23 = vpop.f32.mrb[38].mxu1  ;;  %v1552_v9 = vsel %vm1440_vm12, %v1551_v57, -inf }
 0x98b   :  { %1553 = vmax.xlane.f32.xlu1 %v1552_v9  ;;  %v2488_v25 = vpop.f32.mrb[39].mxu1  ;;  %v2628_v23 = vld [vmem:[%s3591_s12 + $0x68] sm:$0xff]  }
 0x98c   :  { %v2629_v9 = vld [vmem:[%s3591_s12 + $0x28] sm:$0xff]   ;;  %v2630_v25 = vld [vmem:[%s3591_s12 + $0x70] sm:$0xff]  }
 0x990   :  { %v1657_v28 = vpop.f32.mrb[40].mxu1 }
 0x991   :  { %v1663_v29 = vsel %vm395_vm13, %v1657_v28, -1e+30  ;;  %v2499_v30 = vpop.f32.mrb[41].mxu1 }
 0x992   :  { %v1660_v26 = vpop.f32.mrb[42].mxu1  ;;  %v1664_v43 = vsel %vm1440_vm12, %v1663_v29, -inf }
 0x993   :  { %1665 = vmax.xlane.f32.xlu0 %v1664_v43  ;;  %v2500_v31 = vpop.f32.mrb[43].mxu1 }
 0x994   :  { %v2631_v31 = vld [vmem:[%s3591_s12 + $0x30] sm:$0xff]  }
 0x998   :  { %v1768_v18 = vpop.f32.mrb[44].mxu1 }
 0x999   :  { %v1774_v33 = vsel %vm395_vm13, %v1768_v18, -1e+30  ;;  %v2511_v59 = vpop.f32.mrb[45].mxu1 }
 0x99a   :  { %v1771_v13 = vpop.f32.mrb[46].mxu1  ;;  %v1775_v14 = vsel %vm1440_vm12, %v1774_v33, -inf }
 0x99b   :  { %1776 = vmax.xlane.f32.xlu0 %v1775_v14  ;;  %v2512_v35 = vpop.f32.mrb[47].mxu1 }
 0x99c   :  { %1566 = vrot.lane.b32.xlu1 %v3393_v53, %s2901_s0  ;;  %v2632_v35 = vld [vmem:[%s3591_s12 + $0x78] sm:$0xff]  }
 0x9a0   :  { %1788 = vrot.lane.b32.xlu1 %v3393_v53, %s2902_s17 }
 0x9a5   :  { %v3437_v36 = vpop.xlane.xlu0 %1442 }
 0x9a6   :  { %v1444_v37 = vsub.f32 %v1439_v16, %v3437_v36  ;;  %v2623_v16 = vld [vmem:[%s3591_s12 + $0x10] sm:$0xff]   ;;  %vm1450_vm15 = vcmp.gt.f32.partialorder %v3437_v36, -1e+29  ;;  %v2635_v36 = vld [vmem:[%s3593_s14 + $0x8] sm:$0xff]  }
 0x9a7   :  { %2338 = vmatpush3.bf16.msra.mxu1 %v2623_v16 }
 0x9a8   :  { %v1445_v38 = vmul.f32 1.442695, %v1444_v37  ;;  %2339 = vmatprep.subr.bf16.mxu1 %v2624_v17 }
 0x9aa   :  { %2670 = vpow2.f32 %v1445_v38 }
 0x9ab   :  { %2340 = vmatpush3.bf16.msra.mxu1 %v2625_v19 }
 0x9ac   :  { %2341 = vmatprep.subr.bf16.mxu1 %v2626_v21 }
 0x9b1   :  { %1677 = vrot.lane.b32.xlu0 %v3393_v53, %s2891_s7 }
 0x9b4   :  { %v2671_v44 = vpop.eup %2670 }
 0x9b5   :  { %v1453_v40 = vpack.c.bf16 %v2671_v44, %v2671_v44  ;;  %v1447_v53 = vsel %vm1440_vm12, %v2671_v44, 0.0  ;;  %v2633_v44 = vld [vmem:[%s3591_s12 + $0x38] sm:$0xff]  }
 0x9b7   :  { %2480 = vmatmul.mubr.msk.bf16.vlgmr.msra.gmra.mrb[36].mxu0 %vm305_vm10, %v1453_v40 }
 0x9b8   :  { %2491 = vmatprep.mubr.msk.bf16.mxu0 %vm2899_vm0, %v2898_v0 }
 0xa18   :  { %v3445_v24 = vpop.xlane.xlu1 %1553 }
 0xa19   :  { %v1555_v41 = vsub.f32 %v1551_v57, %v3445_v24  ;;  %v2627_v57 = vld [vmem:[%s3591_s12 + $0x20] sm:$0xff]  }
 0xa1a   :  { %2342 = vmatpush3.bf16.msra.mxu1 %v2627_v57 }
 0xa1b   :  { %v1556_v42 = vmul.f32 1.442695, %v1555_v41  ;;  %2343 = vmatprep.subr.bf16.mxu1 %v2628_v23  ;;  %v2634_v41 = vld [vmem:[%s3593_s14] sm:$0xff]  }
 0xa1c   :  { %v1567_v45 = vpop.permute.xlu1 %1566 }
 0xa1d   :  { %2672 = vpow2.f32 %v1556_v42  ;;  %2490 = vmatpush3.bf16.msra.mxu0 %v1567_v45 }
 0xa1e   :  { %2501 = vmatprep.subr.bf16.mxu0 %v2898_v0  ;;  %2344 = vmatpush3.bf16.msra.mxu1 %v2629_v9 }
 0xa1f   :  { %2345 = vmatprep.subr.bf16.mxu1 %v2630_v25 }
 0xa20   :  { %v3449_v27 = vpop.xlane.xlu0 %1665  ;;  %v1789_v63 = vpop.permute.xlu1 %1788 }
 0xa21   :  { %v1667_v46 = vsub.f32 %v1663_v29, %v3449_v27 }
 0xa22   :  { %2346 = vmatpush3.bf16.msra.mxu1 %v2631_v31 }
 0xa23   :  { %v1668_v47 = vmul.f32 1.442695, %v1667_v46  ;;  %2347 = vmatprep.subr.bf16.mxu1 %v2632_v35 }
 0xa25   :  { %2674 = vpow2.f32 %v1668_v47 }
 0xa26   :  { %2348 = vmatpush3.bf16.msra.mxu1 %v2633_v44 }
 0xa27   :  { %v2673_v48 = vpop.eup %2672 }
 0xa28   :  { %v3452_v49 = vpop.xlane.xlu0 %1776  ;;  %v1558_v50 = vsel %vm1440_vm12, %v2673_v48, 0.0  ;;  %v1564_v32 = vpack.c.bf16 %v2673_v48, %v2673_v48 }
 0xa29   :  { %v1778_v34 = vsub.f32 %v1774_v33, %v3452_v49  ;;  %1559 = vadd.xlane.f32.xlu1 %v1558_v50  ;;  %vm1784_vm14 = vcmp.gt.f32.partialorder %v3452_v49, -1e+29 }
 0xa2a   :  { %2492 = vmatmul.mubr.msk.bf16.vlgmr.msra.gmra.mrb[40].mxu0 %vm305_vm10, %v1564_v32 }
 0xa2b   :  { %v1779_v51 = vmul.f32 1.442695, %v1778_v34  ;;  %2503 = vmatprep.mubr.msk.bf16.mxu0 %vm2899_vm0, %v2898_v0 }
 0xa2c   :  { %v1678_v52 = vpop.permute.xlu0 %1677 }
 0xa2d   :  { %2676 = vpow2.f32 %v1779_v51  ;;  %1448 = vadd.xlane.f32.xlu1 %v1447_v53  ;;  %2502 = vmatpush3.bf16.msra.mxu0 %v1678_v52 }
 0xa2e   :  { %2513 = vmatprep.subr.bf16.mxu0 %v2898_v0 }
 0xa2f   :  { %v2675_v54 = vpop.eup %2674 }
 0xa30   :  { %v1670_v20 = vsel %vm1440_vm12, %v2675_v54, 0.0  ;;  %v1676_v62 = vpack.c.bf16 %v2675_v54, %v2675_v54 }
 0xa31   :  { %1671 = vadd.xlane.f32.xlu0 %v1670_v20 }
 0xa32   :  { %2504 = vmatmul.mubr.msk.bf16.vlgmr.msra.gmra.mrb[44].mxu0 %vm305_vm10, %v1676_v62 }
 0xa33   :  { %2514 = vmatpush3.bf16.msra.mxu0 %v1789_v63  ;;  %2515 = vmatprep.mubr.msk.bf16.mxu0 %vm2899_vm0, %v2898_v0 }
 0xa34   :  { %2519 = vmatprep.subr.bf16.mxu0 %v2898_v0 }
 0xa37   :  { %v2677_v55 = vpop.eup %2676 }
 0xa38   :  { %v1781_v60 = vsel %vm1440_vm12, %v2677_v55, 0.0  ;;  %v1787_v61 = vpack.c.bf16 %v2677_v55, %v2677_v55 }
 0xa39   :  { %1782 = vadd.xlane.f32.xlu0 %v1781_v60 }
 0xa3a   :  { %2516 = vmatmul.mubr.msk.bf16.vlgmr.msra.gmra.mrb[48].mxu0 %vm305_vm10, %v1787_v61  ;;  %vm1673_vm10 = vcmp.gt.f32.partialorder %v3449_v27, -1e+29 }
 0xa3b   :  { %2520 = vmatpush3.bf16.msra.mxu0 %v2616_v58  ;;  %2523 = vmatprep.mubr.msk.bf16.mxu0 %vm2899_vm0, %v2898_v0 }
 0xa3c   :  { %2521 = vmatprep.subr.bf16.mxu0 %v2898_v0 }
 0xa3f   :  { %2522 = vmatpush3.bf16.msra.mxu0 %v2617_v1 }
 0xa40   :  { %2527 = vmatprep.subr.bf16.mxu0 %v2898_v0 }
 0xa42   :  { %2524 = vmatmul.mubr.msk.bf16.vlgmr.msra.gmra.mrb[52].mxu0 %vm238_vm3, %v1855_v2 }
 0xa43   :  { %2535 = vmatprep.mubr.msk.bf16.mxu0 %vm2899_vm0, %v2898_v0  ;;  %vm1561_vm0 = vcmp.gt.f32.partialorder %v3445_v24, -1e+29  ;;  %2528 = vmatpush3.bf16.msra.mxu0 %v2634_v41 }
 0xa44   :  { %2529 = vmatprep.subr.bf16.mxu0 %v2898_v0 }
 0xa47   :  { %2530 = vmatpush3.bf16.msra.mxu0 %v2635_v36 }
 0xa48   :  { %2531 = vmatprep.subr.bf16.mxu0 %v2898_v0 }
 0xa8a   :  { %v3483_v3 = vpop.f32.mrb[36].mxu0 }
 0xa8b   :  { %v2481_v4 = vpop.f32.mrb[37].mxu0 }
 0xa8c   :  { %v1495_v5 = vpop.f32.mrb[38].mxu0  ;;  %v2637_v4 = vld [vmem:[%s3593_s14 + $0x18] sm:$0xff]  }
 0xa8d   :  { %v2482_v7 = vpop.f32.mrb[39].mxu0 }
 0xab6   :  { %v1560_v6 = vpop.xlane.xlu1 %1559 }
 0xab7   :  { %2678 = vrcp.f32 %v1560_v6 }
 0xaba   :  { %v1449_v53 = vpop.xlane.xlu1 %1448 }
 0xabe   :  { %v1672_v8 = vpop.xlane.xlu0 %1671 }
 0xabf   :  { %2680 = vrcp.f32 %v1672_v8 }
 0xac1   :  { %v2679_v22 = vpop.eup %2678 }
 0xac2   :  { %v1563_v29 = vsel %vm1561_vm0, %v2679_v22, 0.0 }
 0xac6   :  { %v1783_v28 = vpop.xlane.xlu0 %1782 }
 0xac7   :  { %2682 = vrcp.f32 %v1783_v28 }
 0xac8   :  { %2684 = vrcp.f32 %v1449_v53 }
 0xac9   :  { %v2681_v59 = vpop.eup %2680 }
 0xaca   :  { %v1675_v13 = vsel %vm1673_vm10, %v2681_v59, 0.0 }
 0xad1   :  { %v2683_v42 = vpop.eup %2682 }
 0xad2   :  { %v1786_v45 = vsel %vm1784_vm14, %v2683_v42, 0.0  ;;  %v2685_v54 = vpop.eup %2684 }
 0xad3   :  { %v1452_v49 = vsel %vm1450_vm15, %v2685_v54, 0.0 }
 0xad4   :  { %v1498_v63 = vmul.f32 %v3483_v3, %v1452_v49  ;;  %v2636_v3 = vld [vmem:[%s3593_s14 + $0x10] sm:$0xff]   ;;  %s2903_s14 = smov [#allocation16]  }
 0xad5   :  { %2532 = vmatpush3.bf16.msra.mxu0 %v2636_v3  ;;  %s2179_s9 = sshll.u32 %s2903_s14, 4  ;;  %s2180_s9 = int_to_ptr.vmem [resolvable:$true] %s2179_s9 }
 0xad6   :  { %2533 = vmatprep.subr.bf16.mxu0 %v2898_v0  ;;  %v2272_v0 = vld [vmem:[%s3594_s15] ss:$0 sm:$0xff]  ;;  %s2852_s13 = scalar_lea.vmem %s2180_s9, 32  ;;  %p2857_p6 = scmp.lt.s32.totalorder %s2180_s9, %s2180_s9 }
 0xad7   :  { %p2853_p5 = scmp.ne.s32.totalorder %s2180_s9, %s2852_s13  ;;  %p2858_p7 = scmp.lt.s32.totalorder %s2852_s13, %s2852_s13 }
 0xad9   :  { %2534 = vmatpush3.bf16.msra.mxu0 %v2637_v4  ;;  %p2859_p8 = por %p2858_p7, %p2857_p6 }
 0xadb   :  { %p2860_p9 = pnand %p2859_p8, %p2853_p5 }
 0xafd   :  { %v1606_v30 = vpop.f32.mrb[40].mxu0 }
 0xafe   :  { %v1612_v26 = vmul.f32 %v1606_v30, %v1563_v29  ;;  %v2493_v43 = vpop.f32.mrb[41].mxu0 }
 0xaff   :  { %v1609_v18 = vpop.f32.mrb[42].mxu0 }
 0xb00   :  { %v2494_v33 = vpop.f32.mrb[43].mxu0  ;;  %1836 = vrot.lane.b32.xlu0 %v1612_v26, %s2902_s17 }
 0xb05   :  { %v1717_v14 = vpop.f32.mrb[44].mxu0 }
 0xb06   :  { %v1723_v37 = vmul.f32 %v1717_v14, %v1675_v13  ;;  %v2505_v38 = vpop.f32.mrb[45].mxu0 }
 0xb07   :  { %v1720_v40 = vpop.f32.mrb[46].mxu0 }
 0xb08   :  { %v2506_v24 = vpop.f32.mrb[47].mxu0  ;;  %1840 = vrot.lane.b32.xlu1 %v1723_v37, %s2891_s7 }
 0xb0d   :  { %v1828_v27 = vpop.f32.mrb[48].mxu0 }
 0xb0e   :  { %v1834_v46 = vmul.f32 %v1828_v27, %v1786_v45  ;;  %v2517_v47 = vpop.f32.mrb[49].mxu0 }
 0xb0f   :  { %v1831_v48 = vpop.f32.mrb[50].mxu0 }
 0xb10   :  { %v2518_v50 = vpop.f32.mrb[51].mxu0  ;;  %1844 = vrot.lane.b32.xlu1 %v1834_v46, %s2901_s0 }
 0xb15   :  { %v2074_v32 = vpop.f32.mrb[52].mxu0 }
 0xb16   :  { %v2525_v34 = vpop.f32.mrb[53].mxu0 }
 0xb17   :  { %v2077_v51 = vpop.f32.mrb[54].mxu0 }
 0xb18   :  { %v2526_v52 = vpop.f32.mrb[55].mxu0 }
 0xb72   :  { %v1837_v20 = vpop.permute.xlu0 %1836 }
 0xb73   :  { %v1847_v55 = vsel %vm238_vm3, %v1498_v63, %v1837_v20 }
 0xb7a   :  { %v1841_v62 = vpop.permute.xlu1 %1840 }
 0xb7b   :  { %v1848_v58 = vsel %vm1079_vm9, %v1847_v55, %v1841_v62 }
 0xb82   :  { %v1845_v60 = vpop.permute.xlu1 %1844 }
 0xb83   :  { %v1849_v61 = vsel %vm1082_vm11, %v1848_v58, %v1845_v60 }
 0xb84   :  { %v1850_v1 = vmax.f32 %v1849_v61, 0.0 }
 0xb86   :  { %v1888_v2 = vpack.c.bf16 %v1850_v1, %v1850_v1 }
 0xb88   :  { %2017 = vmatprep.mubr.bf16.mxu1 %v1888_v2 }
 0xb89   :  { %2018 = vmatmul.mubr.bf16.vlgmr.msra.gmra.mrb[48].mxu1 %v3384_v39 }
 0xc5c   :  { %v2349_v39 = vpop.f32.mrb[48].mxu1 }
 0xc5d   :  { %v2350_v5 = vpop.f32.mrb[49].mxu1 }
 0xc5e   :  { %v2351_v7 = vadd.f32 %v2350_v5, %v2349_v39  ;;  %v2352_v10 = vpop.f32.mrb[50].mxu1 }
 0xc5f   :  { %v2353_v11 = vpop.f32.mrb[51].mxu1 }
 0xc60   :  { %v2075_v12 = vadd.f32 %v2351_v7, %v2074_v32 }
 0xc62   :  { %v2087_v15 = vadd.f32 %v2271_v56, %v2075_v12 }
 0xc64   :  { %v2088_v16 = vmax.f32 %v2087_v15, 0.0 }
 0xc66   :  { %v2097_v6 = vpack.c.bf16 %v2088_v16, %v2088_v16 }
 0xc68   :  { %2536 = vmatmul.mubr.msk.bf16.vlgmr.msra.gmra.mrb[56].mxu0 %vm1079_vm9, %v2097_v6 }
 0xd3b   :  { %v2166_v17 = vpop.f32.mrb[56].mxu0 }
 0xd3c   :  { %v2167_v19 = vadd.f32 %v2272_v0, %v2166_v17  ;;  %v2537_v21 = vpop.f32.mrb[57].mxu0 }
 0xd3d   :  { %v2169_v8 = vpop.f32.mrb[58].mxu0 }
 0xd3e   :  { %2172 = vst [vmem:[#allocation16] sm:$0x3] %v2167_v19  ;;  %v2538_v57 = vpop.f32.mrb[59].mxu0 }
 0xd3f   :  { %2863 = shalt.err (!%p2860_p9)
}
 0xd40   :  { %s2864_s15 = scalar_lea.hbm %s3595_s16, 32 }
 0xd41   :  { %p2865_p10 = scmp.ne.s32.totalorder %s3595_s16, %s2864_s15  ;;  %p2868_p11 = scmp.lt.u32.totalorder %s2864_s15, %s3595_s16 }
 0xd43   :  { %p2870_p12 = pnand %p2868_p11, %p2865_p10 }
 0xd45   :  { %2873 = shalt.err (!%p2870_p12)
}
 0xd46   :  { %2182 = dma.vmem_to_hbm [thread:$0]  %s2180_s9, 32, %s3595_s16, [#allocation6]  }
 0xd47   :  { %2884 = dma.done.wait [#allocation6], 32  }
 0xd48   :  { %2885 = vsyncadd [#allocation6], 4294967264 }
 0xd49   :  { %2186 = vsyncpa [#allocation5], 1 }
 0xd4a   :  { %2187 = vsyncpa [#allocation8], 1 }
 0xd4b   :  { %2188 = vsyncpa [#allocation11], 1 }
 0xd4c   :  { %2189 = vsyncpa [#allocation14], 1 }
 0xd4d   :  { %2190 = vsyncpa [#allocation6], 1 }

</bundles_post_ra>
